<compile_context>
chip_gen: v5e
topology: v5e:2x2
jax: 0.10.0
libtpu: 0.0.40
codegen_flags: <defaults>
</compile_context>

<pallas_src>
import math
from functools import partial

import jax
import jax.numpy as jnp
from jax.experimental import pallas as pl
from jax.experimental.pallas import tpu as pltpu


def _mha_kernel(q_ref, x_ref, mask_ref,
                wq_ref, bq_ref, wk_ref, bk_ref, wv_ref, bv_ref, wo_ref, bo_ref,
                feat_ref, attn_ref,
                ctx_ref,
                *, num_heads, d_k, block_b, lq, lk, compute_dtype):
    """One grid step == `block_b` batch elements.

    q_ref    : (Bb, Lq, D)   query sequences
    x_ref    : (Bb, Lk, D)   inputs (key AND value source)
    mask_ref : (Bb, 1, Lk)   mask (0 == masked out)
    w*_ref   : (D, D), b*_ref: (1, D)
    feat_ref : (Bb, Lq, D)
    attn_ref : (Bb, H, Lq, Lk)
    ctx_ref  : (Bb*Lq, D) f32 VMEM scratch -- merged-head context rows, fed to a
               single fused output projection (replaces the old concatenate).
    """
    d_model = num_heads * d_k
    cd = compute_dtype

    # --- Q/K/V projections, batched over all Bb*L rows (fat MXU matmuls,
    # --- bf16 operands, f32 accumulation).
    q2d = q_ref[...].reshape(block_b * lq, d_model).astype(cd)
    x2d = x_ref[...].reshape(block_b * lk, d_model).astype(cd)

    Q = jnp.dot(q2d, wq_ref[...].astype(cd),
                preferred_element_type=jnp.float32) + bq_ref[0]
    K = jnp.dot(x2d, wk_ref[...].astype(cd),
                preferred_element_type=jnp.float32) + bk_ref[0]
    V = jnp.dot(x2d, wv_ref[...].astype(cd),
                preferred_element_type=jnp.float32) + bv_ref[0]

    # Head split once (minor-dim reshape); no per-head lane slicing below.
    QH = Q.reshape(block_b * lq, num_heads, d_k)
    KH = K.reshape(block_b * lk, num_heads, d_k)
    VH = V.reshape(block_b * lk, num_heads, d_k)

    scale = 1.0 / math.sqrt(d_k)
    neg_inf = jnp.float32(-jnp.inf)   # matches masked_fill(mask == 0, -inf)
    # TODO(synk): fully-masked rows produce NaN exactly like the PyTorch module;
    # swap neg_inf for a large finite value (-1e30) if such rows can occur.

    for b in range(block_b):          # short static loop over folded batch elems
        # Head-major views (H, L, d_k) via one layout-aware permute each.
        Qh = pltpu.einshape("qhd->hqd", QH[b * lq:(b + 1) * lq]).astype(cd)
        Kh = pltpu.einshape("khd->hkd", KH[b * lk:(b + 1) * lk]).astype(cd)
        Vh = pltpu.einshape("khd->hkd", VH[b * lk:(b + 1) * lk]).astype(cd)

        # Head-batched score matmul; contracts the last dim of both operands, so
        # no K^T is ever materialized.
        scores = jnp.einsum("hqd,hkd->hqk", Qh, Kh,
                            preferred_element_type=jnp.float32) * scale
        masked = (mask_ref[b] == 0).reshape(1, 1, lk)   # broadcast to (H, Lq, Lk)
        scores = jnp.where(masked, neg_inf, scores)

        # softmax(-1) in f32; reciprocal goes to the otherwise-idle EUP slot.
        s_max = jnp.max(scores, axis=-1, keepdims=True)
        e = jnp.exp(scores - s_max)
        denom = jnp.sum(e, axis=-1, keepdims=True)
        p = e * pl.reciprocal(denom, approx=True)

        attn_ref[b] = p.astype(attn_ref.dtype)

        # Head-batched context matmul, merge heads back to (Lq, D) and park the
        # rows in the VMEM scratch for one fused output projection.
        ctx_h = jnp.einsum("hqk,hkd->hqd", p.astype(cd), Vh,
                           preferred_element_type=jnp.float32)   # (H, Lq, d_k)
        ctx = pltpu.einshape("hqd->qhd", ctx_h).reshape(lq, d_model)
        ctx_ref[b * lq:(b + 1) * lq, :] = ctx

    # --- single fused output projection over all Bb*Lq rows.
    feat = jnp.dot(ctx_ref[...].astype(cd), wo_ref[...].astype(cd),
                   preferred_element_type=jnp.float32) + bo_ref[0]
    feat_ref[...] = feat.reshape(block_b, lq, d_model).astype(feat_ref.dtype)


def _pick_block_b(batch, lq, target_rows=256):
    """Fold batch elements until the flattened projection has ~target_rows rows,
    but keep >= 2 grid steps when the batch allows (v7x has 2 TensorCores)."""
    bb = max(1, min(batch, target_rows // max(lq, 1)))
    while batch % bb:
        bb -= 1
    if bb == batch and batch >= 2:
        bb = max(1, batch // 2)
        while batch % bb:
            bb -= 1
    return bb


def self_attention_feature_extract(inputs, query, mask, params, *, num_heads,
                                   compute_dtype=jnp.bfloat16,
                                   attn_dtype=jnp.float32,
                                   block_b=None):
    """inputs: (B, Lk, D) used as key & value; query: (B, Lq, D); mask: (B, Lk)."""
    B, Lk, D = inputs.shape
    _, Lq, _ = query.shape
    assert D % num_heads == 0
    d_k = D // num_heads

    if block_b is None:
        block_b = _pick_block_b(B, Lq)
    assert B % block_b == 0
    grid = (B // block_b,)

    mask3 = mask.reshape(B, 1, Lk)

    wq, bq = params["wq"], params["bq"]
    wk, bk = params["wk"], params["bk"]
    wv, bv = params["wv"], params["bv"]
    wo, bo = params["wo"], params["bo"]

    # Weights/biases: constant index_map => fetched once, never re-DMA'd across
    # grid steps.  (At production d_model, also single-buffer them with
    # pipeline_mode=pl.Buffered(1); negligible at D=32.)
    w_spec = pl.BlockSpec((D, D), lambda g: (0, 0))
    b_spec = pl.BlockSpec((1, D), lambda g: (0, 0))

    kernel = partial(_mha_kernel, num_heads=num_heads, d_k=d_k,
                     block_b=block_b, lq=Lq, lk=Lk, compute_dtype=compute_dtype)

    feat, attn = pl.pallas_call(
        kernel,
        out_shape=(
            jax.ShapeDtypeStruct((B, Lq, D), query.dtype),
            jax.ShapeDtypeStruct((B, num_heads, Lq, Lk), attn_dtype),
        ),
        grid_spec=pltpu.PrefetchScalarGridSpec(
            num_scalar_prefetch=0,
            grid=grid,
            in_specs=[
                pl.BlockSpec((block_b, Lq, D), lambda g: (g, 0, 0)),   # query
                pl.BlockSpec((block_b, Lk, D), lambda g: (g, 0, 0)),   # key/value
                pl.BlockSpec((block_b, 1, Lk), lambda g: (g, 0, 0)),   # mask
                w_spec, b_spec,   # Wq, bq
                w_spec, b_spec,   # Wk, bk
                w_spec, b_spec,   # Wv, bv
                w_spec, b_spec,   # Wo, bo
            ],
            out_specs=[
                pl.BlockSpec((block_b, Lq, D), lambda g: (g, 0, 0)),
                pl.BlockSpec((block_b, num_heads, Lq, Lk),
                             lambda g: (g, 0, 0, 0)),
            ],
            scratch_shapes=[pltpu.VMEM((block_b * Lq, D), jnp.float32)],
        ),
        compiler_params=pltpu.CompilerParams(
            dimension_semantics=("parallel",),
            vmem_limit_bytes=64 * 1024 * 1024,
        ),
    )(query, inputs, mask3, wq, bq, wk, bk, wv, bv, wo, bo)

    return feat, attn


def reference(inputs, query, mask, params, *, num_heads,
              compute_dtype=jnp.float32):
    """Plain-JAX replica of the PyTorch forward (eval mode).  `compute_dtype`
    mirrors the kernel's matmul-operand rounding (bf16) with f32 accumulation."""
    B, Lk, D = inputs.shape
    Lq = query.shape[1]
    d_k = D // num_heads
    cd = compute_dtype

    def lin(x, w, b):
        return jnp.einsum("bld,de->ble", x.astype(cd), w.astype(cd),
                          preferred_element_type=jnp.float32) + b[0]

    Q = lin(query, params["wq"], params["bq"])
    K = lin(inputs, params["wk"], params["bk"])
    V = lin(inputs, params["wv"], params["bv"])

    rh = lambda t, L: t.reshape(B, L, num_heads, d_k).transpose(0, 2, 1, 3)
    Qh, Kh, Vh = rh(Q, Lq), rh(K, Lk), rh(V, Lk)

    scores = jnp.einsum("bhqd,bhkd->bhqk", Qh.astype(cd), Kh.astype(cd),
                        preferred_element_type=jnp.float32) / math.sqrt(d_k)
    scores = jnp.where((mask == 0)[:, None, None, :], -jnp.inf, scores)
    p = jax.nn.softmax(scores, axis=-1)

    ctx = jnp.einsum("bhqk,bhkd->bhqd", p.astype(cd), Vh.astype(cd),
                     preferred_element_type=jnp.float32)
    ctx = ctx.transpose(0, 2, 1, 3).reshape(B, Lq, D)
    feat = jnp.einsum("bld,de->ble", ctx.astype(cd), params["wo"].astype(cd),
                      preferred_element_type=jnp.float32) + params["bo"][0]
    return feat, p


def init_params(key, d_model):
    ks = jax.random.split(key, 8)
    std = 1.0 / math.sqrt(d_model)
    p = {}
    for i, n in enumerate(["q", "k", "v", "o"]):
        p[f"w{n}"] = jax.random.uniform(ks[2 * i], (d_model, d_model),
                                        jnp.float32, -std, std)
        p[f"b{n}"] = jax.random.uniform(ks[2 * i + 1], (1, d_model),
                                        jnp.float32, -std, std)
    return p


if __name__ == "__main__":
    B, Lq, Lk, D, H = 4, 8, 16, 32, 4   # d_k = 8

    root = jax.random.PRNGKey(0)
    k_in, k_q, k_p = jax.random.split(root, 3)

    inputs = jax.random.normal(k_in, (B, Lk, D), jnp.float32)   # key & value source
    query = jax.random.normal(k_q, (B, Lq, D), jnp.float32)
    # mask: 1 = attend, 0 = masked out
    mask = (jnp.ones((B, Lk), jnp.float32)
            .at[1, -3:].set(0.0)
            .at[3, :5].set(0.0))

    params = init_params(k_p, D)

    feat, attn = self_attention_feature_extract(inputs, query, mask, params,
                                                num_heads=H)
    jax.block_until_ready((feat, attn))

    assert feat.shape == (B, Lq, D) and attn.shape == (B, H, Lq, Lk)

    # Validate against a bf16-matched plain-JAX reference (kernel matmul operands
    # are bf16 with f32 accumulation; softmax uses an approx reciprocal).
    feat_ref, attn_ref = reference(inputs, query, mask, params, num_heads=H,
                                   compute_dtype=jnp.bfloat16)
    assert jnp.allclose(feat, feat_ref, atol=2e-2, rtol=2e-2)
    assert jnp.allclose(attn, attn_ref, atol=5e-3, rtol=5e-3)

    print("KERNEL_OK")
</pallas_src>

<mosaic_0001>
module attributes {stable_mosaic.version = 11 : i64} {
  func.func @_mha_kernel(%arg0: i32, %arg1: memref<2x8x32xf32, #tpu.memory_space<vmem>>, %arg2: memref<2x16x32xf32, #tpu.memory_space<vmem>>, %arg3: memref<2x1x16xf32, #tpu.memory_space<vmem>>, %arg4: memref<32x32xf32, #tpu.memory_space<vmem>>, %arg5: memref<1x32xf32, #tpu.memory_space<vmem>>, %arg6: memref<32x32xf32, #tpu.memory_space<vmem>>, %arg7: memref<1x32xf32, #tpu.memory_space<vmem>>, %arg8: memref<32x32xf32, #tpu.memory_space<vmem>>, %arg9: memref<1x32xf32, #tpu.memory_space<vmem>>, %arg10: memref<32x32xf32, #tpu.memory_space<vmem>>, %arg11: memref<1x32xf32, #tpu.memory_space<vmem>>, %arg12: memref<2x8x32xf32, #tpu.memory_space<vmem>>, %arg13: memref<2x4x8x16xf32, #tpu.memory_space<vmem>>, %arg14: memref<16x32xf32, #tpu.memory_space<vmem>>) attributes {dimension_semantics = [#tpu.dimension_semantics<parallel>], iteration_bounds = array<i64: 2>, scalar_prefetch = 0 : i64, scratch_operands = 1 : i64, tpu.core_type = #tpu.core_type<tc>, window_params = [{transform_indices = @transform_0, window_bounds = array<i64: 2, 8, 32>}, {transform_indices = @transform_1, window_bounds = array<i64: 2, 16, 32>}, {transform_indices = @transform_2, window_bounds = array<i64: 2, 1, 16>}, {pipeline_mode = #tpu.pipeline_mode<synchronous>, transform_indices = @transform_3, window_bounds = array<i64: 32, 32>}, {pipeline_mode = #tpu.pipeline_mode<synchronous>, transform_indices = @transform_4, window_bounds = array<i64: 1, 32>}, {pipeline_mode = #tpu.pipeline_mode<synchronous>, transform_indices = @transform_5, window_bounds = array<i64: 32, 32>}, {pipeline_mode = #tpu.pipeline_mode<synchronous>, transform_indices = @transform_6, window_bounds = array<i64: 1, 32>}, {pipeline_mode = #tpu.pipeline_mode<synchronous>, transform_indices = @transform_7, window_bounds = array<i64: 32, 32>}, {pipeline_mode = #tpu.pipeline_mode<synchronous>, transform_indices = @transform_8, window_bounds = array<i64: 1, 32>}, {pipeline_mode = #tpu.pipeline_mode<synchronous>, transform_indices = @transform_9, window_bounds = array<i64: 32, 32>}, {pipeline_mode = #tpu.pipeline_mode<synchronous>, transform_indices = @transform_10, window_bounds = array<i64: 1, 32>}, {transform_indices = @transform_11, window_bounds = array<i64: 2, 8, 32>}, {transform_indices = @transform_12, window_bounds = array<i64: 2, 4, 8, 16>}]} {
    %c0 = arith.constant 0 : index
    %c0_0 = arith.constant 0 : index
    %c0_1 = arith.constant 0 : index
    %0 = vector.load %arg1[%c0, %c0_0, %c0_1] : memref<2x8x32xf32, #tpu.memory_space<vmem>>, vector<2x8x32xf32>
    %1 = vector.shape_cast %0 : vector<2x8x32xf32> to vector<16x32xf32>
    %2 = arith.truncf %1 : vector<16x32xf32> to vector<16x32xbf16>
    %c0_2 = arith.constant 0 : index
    %c0_3 = arith.constant 0 : index
    %c0_4 = arith.constant 0 : index
    %3 = vector.load %arg2[%c0_2, %c0_3, %c0_4] : memref<2x16x32xf32, #tpu.memory_space<vmem>>, vector<2x16x32xf32>
    %4 = vector.shape_cast %3 : vector<2x16x32xf32> to vector<32x32xf32>
    %5 = arith.truncf %4 : vector<32x32xf32> to vector<32x32xbf16>
    %c0_5 = arith.constant 0 : index
    %c0_6 = arith.constant 0 : index
    %6 = vector.load %arg4[%c0_5, %c0_6] : memref<32x32xf32, #tpu.memory_space<vmem>>, vector<32x32xf32>
    %7 = arith.truncf %6 : vector<32x32xf32> to vector<32x32xbf16>
    %cst = arith.constant dense<0.000000e+00> : vector<16x32xf32>
    %8 = tpu.matmul %2, %7, %cst {dimension_numbers = #tpu.dot_dimension_numbers<[1], [0], [0], [1], [0, 0, 1, 1], [], []>} : vector<16x32xbf16>, vector<32x32xbf16>, vector<16x32xf32> -> vector<16x32xf32>
    %c0_7 = arith.constant 0 : index
    %c0_8 = arith.constant 0 : index
    %9 = vector.load %arg5[%c0_7, %c0_8] : memref<1x32xf32, #tpu.memory_space<vmem>>, vector<1x32xf32>
    %10 = vector.shape_cast %9 : vector<1x32xf32> to vector<32xf32>
    %11 = vector.shape_cast %10 : vector<32xf32> to vector<1x32xf32>
    %12 = vector.broadcast %11 : vector<1x32xf32> to vector<16x32xf32>
    %13 = arith.addf %8, %12 : vector<16x32xf32>
    %c0_9 = arith.constant 0 : index
    %c0_10 = arith.constant 0 : index
    %14 = vector.load %arg6[%c0_9, %c0_10] : memref<32x32xf32, #tpu.memory_space<vmem>>, vector<32x32xf32>
    %15 = arith.truncf %14 : vector<32x32xf32> to vector<32x32xbf16>
    %cst_11 = arith.constant dense<0.000000e+00> : vector<32x32xf32>
    %16 = tpu.matmul %5, %15, %cst_11 {dimension_numbers = #tpu.dot_dimension_numbers<[1], [0], [0], [1], [0, 0, 1, 1], [], []>} : vector<32x32xbf16>, vector<32x32xbf16>, vector<32x32xf32> -> vector<32x32xf32>
    %c0_12 = arith.constant 0 : index
    %c0_13 = arith.constant 0 : index
    %17 = vector.load %arg7[%c0_12, %c0_13] : memref<1x32xf32, #tpu.memory_space<vmem>>, vector<1x32xf32>
    %18 = vector.shape_cast %17 : vector<1x32xf32> to vector<32xf32>
    %19 = vector.shape_cast %18 : vector<32xf32> to vector<1x32xf32>
    %20 = vector.broadcast %19 : vector<1x32xf32> to vector<32x32xf32>
    %21 = arith.addf %16, %20 : vector<32x32xf32>
    %c0_14 = arith.constant 0 : index
    %c0_15 = arith.constant 0 : index
    %22 = vector.load %arg8[%c0_14, %c0_15] : memref<32x32xf32, #tpu.memory_space<vmem>>, vector<32x32xf32>
    %23 = arith.truncf %22 : vector<32x32xf32> to vector<32x32xbf16>
    %cst_16 = arith.constant dense<0.000000e+00> : vector<32x32xf32>
    %24 = tpu.matmul %5, %23, %cst_16 {dimension_numbers = #tpu.dot_dimension_numbers<[1], [0], [0], [1], [0, 0, 1, 1], [], []>} : vector<32x32xbf16>, vector<32x32xbf16>, vector<32x32xf32> -> vector<32x32xf32>
    %c0_17 = arith.constant 0 : index
    %c0_18 = arith.constant 0 : index
    %25 = vector.load %arg9[%c0_17, %c0_18] : memref<1x32xf32, #tpu.memory_space<vmem>>, vector<1x32xf32>
    %26 = vector.shape_cast %25 : vector<1x32xf32> to vector<32xf32>
    %27 = vector.shape_cast %26 : vector<32xf32> to vector<1x32xf32>
    %28 = vector.broadcast %27 : vector<1x32xf32> to vector<32x32xf32>
    %29 = arith.addf %24, %28 : vector<32x32xf32>
    %30 = vector.shape_cast %13 : vector<16x32xf32> to vector<16x4x8xf32>
    %31 = vector.shape_cast %21 : vector<32x32xf32> to vector<32x4x8xf32>
    %32 = vector.shape_cast %29 : vector<32x32xf32> to vector<32x4x8xf32>
    %33 = vector.extract_strided_slice %30 {offsets = [0, 0, 0], sizes = [8, 4, 8], strides = [1, 1, 1]} : vector<16x4x8xf32> to vector<8x4x8xf32>
    %34 = tpu.transpose %33, [1, 0, 2] : vector<8x4x8xf32> -> vector<4x8x8xf32>
    %35 = arith.truncf %34 : vector<4x8x8xf32> to vector<4x8x8xbf16>
    %36 = vector.extract_strided_slice %31 {offsets = [0, 0, 0], sizes = [16, 4, 8], strides = [1, 1, 1]} : vector<32x4x8xf32> to vector<16x4x8xf32>
    %37 = tpu.transpose %36, [1, 0, 2] : vector<16x4x8xf32> -> vector<4x16x8xf32>
    %38 = arith.truncf %37 : vector<4x16x8xf32> to vector<4x16x8xbf16>
    %39 = vector.extract_strided_slice %32 {offsets = [0, 0, 0], sizes = [16, 4, 8], strides = [1, 1, 1]} : vector<32x4x8xf32> to vector<16x4x8xf32>
    %40 = tpu.transpose %39, [1, 0, 2] : vector<16x4x8xf32> -> vector<4x16x8xf32>
    %41 = arith.truncf %40 : vector<4x16x8xf32> to vector<4x16x8xbf16>
    "tpu.trace_start"() <{level = 10 : i32, message = "hqd,hkd->hqk"}> : () -> ()
    %cst_19 = arith.constant dense<0.000000e+00> : vector<4x8x16xf32>
    %42 = tpu.matmul %35, %38, %cst_19 {dimension_numbers = #tpu.dot_dimension_numbers<[2], [2], [1], [1], [0, 0, 0, 1, 1, 1], [0], [0]>} : vector<4x8x8xbf16>, vector<4x16x8xbf16>, vector<4x8x16xf32> -> vector<4x8x16xf32>
    "tpu.trace_stop"() : () -> ()
    %cst_20 = arith.constant 0.353553385 : f32
    %43 = vector.broadcast %cst_20 : f32 to vector<4x8x16xf32>
    %44 = arith.mulf %42, %43 : vector<4x8x16xf32>
    %c0_21 = arith.constant 0 : index
    %c0_22 = arith.constant 0 : index
    %c0_23 = arith.constant 0 : index
    %45 = vector.load %arg3[%c0_21, %c0_22, %c0_23] : memref<2x1x16xf32, #tpu.memory_space<vmem>>, vector<1x1x16xf32>
    %46 = vector.shape_cast %45 : vector<1x1x16xf32> to vector<1x16xf32>
    %cst_24 = arith.constant 0.000000e+00 : f32
    %47 = vector.broadcast %cst_24 : f32 to vector<1x16xf32>
    %48 = arith.cmpf oeq, %46, %47 : vector<1x16xf32>
    %49 = vector.shape_cast %48 : vector<1x16xi1> to vector<1x1x16xi1>
    %cst_25 = arith.constant 0xFF800000 : f32
    %50 = vector.shape_cast %49 : vector<1x1x16xi1> to vector<1x1x16xi1>
    %51 = vector.broadcast %50 : vector<1x1x16xi1> to vector<4x8x16xi1>
    %52 = vector.broadcast %cst_25 : f32 to vector<4x8x16xf32>
    %53 = arith.select %51, %52, %44 : vector<4x8x16xi1>, vector<4x8x16xf32>
    %cst_26 = arith.constant dense<0xFF800000> : vector<4x8xf32>
    %54 = vector.multi_reduction <maximumf>, %53, %cst_26 [2] : vector<4x8x16xf32> to vector<4x8xf32>
    %55 = vector.shape_cast %54 : vector<4x8xf32> to vector<4x8x1xf32>
    %56 = vector.broadcast %55 : vector<4x8x1xf32> to vector<4x8x16xf32>
    %57 = arith.subf %53, %56 : vector<4x8x16xf32>
    %58 = math.exp %57 : vector<4x8x16xf32>
    %cst_27 = arith.constant dense<0.000000e+00> : vector<4x8xf32>
    %59 = vector.multi_reduction <add>, %58, %cst_27 [2] : vector<4x8x16xf32> to vector<4x8xf32>
    %60 = vector.shape_cast %59 : vector<4x8xf32> to vector<4x8x1xf32>
    %61 = tpu.reciprocal %60 {approx = true} : vector<4x8x1xf32> -> vector<4x8x1xf32>
    %62 = vector.broadcast %61 : vector<4x8x1xf32> to vector<4x8x16xf32>
    %63 = arith.mulf %58, %62 : vector<4x8x16xf32>
    %c0_28 = arith.constant 0 : index
    %c0_29 = arith.constant 0 : index
    %c0_30 = arith.constant 0 : index
    %c0_31 = arith.constant 0 : index
    %64 = vector.load %arg13[%c0_28, %c0_29, %c0_30, %c0_31] : memref<2x4x8x16xf32, #tpu.memory_space<vmem>>, vector<1x4x8x16xf32>
    %65 = vector.shape_cast %64 : vector<1x4x8x16xf32> to vector<4x8x16xf32>
    %66 = vector.shape_cast %63 : vector<4x8x16xf32> to vector<1x4x8x16xf32>
    tpu.vector_store %arg13[%c0_28, %c0_29, %c0_30, %c0_31], %66 {strides = array<i32>} : memref<2x4x8x16xf32, #tpu.memory_space<vmem>>, vector<1x4x8x16xf32>,
    %67 = arith.truncf %63 : vector<4x8x16xf32> to vector<4x8x16xbf16>
    "tpu.trace_start"() <{level = 10 : i32, message = "hqk,hkd->hqd"}> : () -> ()
    %cst_32 = arith.constant dense<0.000000e+00> : vector<4x8x8xf32>
    %68 = tpu.matmul %67, %41, %cst_32 {dimension_numbers = #tpu.dot_dimension_numbers<[2], [1], [1], [2], [0, 0, 0, 1, 1, 2], [0], [0]>} : vector<4x8x16xbf16>, vector<4x16x8xbf16>, vector<4x8x8xf32> -> vector<4x8x8xf32>
    "tpu.trace_stop"() : () -> ()
    %69 = tpu.transpose %68, [1, 0, 2] : vector<4x8x8xf32> -> vector<8x4x8xf32>
    %70 = vector.shape_cast %69 : vector<8x4x8xf32> to vector<8x32xf32>
    %c0_33 = arith.constant 0 : index
    %c0_34 = arith.constant 0 : index
    %71 = vector.load %arg14[%c0_33, %c0_34] : memref<16x32xf32, #tpu.memory_space<vmem>>, vector<8x32xf32>
    tpu.vector_store %arg14[%c0_33, %c0_34], %70 {strides = array<i32>} : memref<16x32xf32, #tpu.memory_space<vmem>>, vector<8x32xf32>,
    %72 = vector.extract_strided_slice %30 {offsets = [8, 0, 0], sizes = [8, 4, 8], strides = [1, 1, 1]} : vector<16x4x8xf32> to vector<8x4x8xf32>
    %73 = tpu.transpose %72, [1, 0, 2] : vector<8x4x8xf32> -> vector<4x8x8xf32>
    %74 = arith.truncf %73 : vector<4x8x8xf32> to vector<4x8x8xbf16>
    %75 = vector.extract_strided_slice %31 {offsets = [16, 0, 0], sizes = [16, 4, 8], strides = [1, 1, 1]} : vector<32x4x8xf32> to vector<16x4x8xf32>
    %76 = tpu.transpose %75, [1, 0, 2] : vector<16x4x8xf32> -> vector<4x16x8xf32>
    %77 = arith.truncf %76 : vector<4x16x8xf32> to vector<4x16x8xbf16>
    %78 = vector.extract_strided_slice %32 {offsets = [16, 0, 0], sizes = [16, 4, 8], strides = [1, 1, 1]} : vector<32x4x8xf32> to vector<16x4x8xf32>
    %79 = tpu.transpose %78, [1, 0, 2] : vector<16x4x8xf32> -> vector<4x16x8xf32>
    %80 = arith.truncf %79 : vector<4x16x8xf32> to vector<4x16x8xbf16>
    "tpu.trace_start"() <{level = 10 : i32, message = "hqd,hkd->hqk"}> : () -> ()
    %cst_35 = arith.constant dense<0.000000e+00> : vector<4x8x16xf32>
    %81 = tpu.matmul %74, %77, %cst_35 {dimension_numbers = #tpu.dot_dimension_numbers<[2], [2], [1], [1], [0, 0, 0, 1, 1, 1], [0], [0]>} : vector<4x8x8xbf16>, vector<4x16x8xbf16>, vector<4x8x16xf32> -> vector<4x8x16xf32>
    "tpu.trace_stop"() : () -> ()
    %cst_36 = arith.constant 0.353553385 : f32
    %82 = vector.broadcast %cst_36 : f32 to vector<4x8x16xf32>
    %83 = arith.mulf %81, %82 : vector<4x8x16xf32>
    %c1 = arith.constant 1 : index
    %c0_37 = arith.constant 0 : index
    %c0_38 = arith.constant 0 : index
    %84 = vector.load %arg3[%c1, %c0_37, %c0_38] : memref<2x1x16xf32, #tpu.memory_space<vmem>>, vector<1x1x16xf32>
    %85 = vector.shape_cast %84 : vector<1x1x16xf32> to vector<1x16xf32>
    %cst_39 = arith.constant 0.000000e+00 : f32
    %86 = vector.broadcast %cst_39 : f32 to vector<1x16xf32>
    %87 = arith.cmpf oeq, %85, %86 : vector<1x16xf32>
    %88 = vector.shape_cast %87 : vector<1x16xi1> to vector<1x1x16xi1>
    %cst_40 = arith.constant 0xFF800000 : f32
    %89 = vector.shape_cast %88 : vector<1x1x16xi1> to vector<1x1x16xi1>
    %90 = vector.broadcast %89 : vector<1x1x16xi1> to vector<4x8x16xi1>
    %91 = vector.broadcast %cst_40 : f32 to vector<4x8x16xf32>
    %92 = arith.select %90, %91, %83 : vector<4x8x16xi1>, vector<4x8x16xf32>
    %cst_41 = arith.constant dense<0xFF800000> : vector<4x8xf32>
    %93 = vector.multi_reduction <maximumf>, %92, %cst_41 [2] : vector<4x8x16xf32> to vector<4x8xf32>
    %94 = vector.shape_cast %93 : vector<4x8xf32> to vector<4x8x1xf32>
    %95 = vector.broadcast %94 : vector<4x8x1xf32> to vector<4x8x16xf32>
    %96 = arith.subf %92, %95 : vector<4x8x16xf32>
    %97 = math.exp %96 : vector<4x8x16xf32>
    %cst_42 = arith.constant dense<0.000000e+00> : vector<4x8xf32>
    %98 = vector.multi_reduction <add>, %97, %cst_42 [2] : vector<4x8x16xf32> to vector<4x8xf32>
    %99 = vector.shape_cast %98 : vector<4x8xf32> to vector<4x8x1xf32>
    %100 = tpu.reciprocal %99 {approx = true} : vector<4x8x1xf32> -> vector<4x8x1xf32>
    %101 = vector.broadcast %100 : vector<4x8x1xf32> to vector<4x8x16xf32>
    %102 = arith.mulf %97, %101 : vector<4x8x16xf32>
    %c1_43 = arith.constant 1 : index
    %c0_44 = arith.constant 0 : index
    %c0_45 = arith.constant 0 : index
    %c0_46 = arith.constant 0 : index
    %103 = vector.load %arg13[%c1_43, %c0_44, %c0_45, %c0_46] : memref<2x4x8x16xf32, #tpu.memory_space<vmem>>, vector<1x4x8x16xf32>
    %104 = vector.shape_cast %103 : vector<1x4x8x16xf32> to vector<4x8x16xf32>
    %105 = vector.shape_cast %102 : vector<4x8x16xf32> to vector<1x4x8x16xf32>
    tpu.vector_store %arg13[%c1_43, %c0_44, %c0_45, %c0_46], %105 {strides = array<i32>} : memref<2x4x8x16xf32, #tpu.memory_space<vmem>>, vector<1x4x8x16xf32>,
    %106 = arith.truncf %102 : vector<4x8x16xf32> to vector<4x8x16xbf16>
    "tpu.trace_start"() <{level = 10 : i32, message = "hqk,hkd->hqd"}> : () -> ()
    %cst_47 = arith.constant dense<0.000000e+00> : vector<4x8x8xf32>
    %107 = tpu.matmul %106, %80, %cst_47 {dimension_numbers = #tpu.dot_dimension_numbers<[2], [1], [1], [2], [0, 0, 0, 1, 1, 2], [0], [0]>} : vector<4x8x16xbf16>, vector<4x16x8xbf16>, vector<4x8x8xf32> -> vector<4x8x8xf32>
    "tpu.trace_stop"() : () -> ()
    %108 = tpu.transpose %107, [1, 0, 2] : vector<4x8x8xf32> -> vector<8x4x8xf32>
    %109 = vector.shape_cast %108 : vector<8x4x8xf32> to vector<8x32xf32>
    %c8 = arith.constant 8 : index
    %c0_48 = arith.constant 0 : index
    %110 = vector.load %arg14[%c8, %c0_48] : memref<16x32xf32, #tpu.memory_space<vmem>>, vector<8x32xf32>
    tpu.vector_store %arg14[%c8, %c0_48], %109 {strides = array<i32>} : memref<16x32xf32, #tpu.memory_space<vmem>>, vector<8x32xf32>,
    %c0_49 = arith.constant 0 : index
    %c0_50 = arith.constant 0 : index
    %111 = vector.load %arg14[%c0_49, %c0_50] : memref<16x32xf32, #tpu.memory_space<vmem>>, vector<16x32xf32>
    %112 = arith.truncf %111 : vector<16x32xf32> to vector<16x32xbf16>
    %c0_51 = arith.constant 0 : index
    %c0_52 = arith.constant 0 : index
    %113 = vector.load %arg10[%c0_51, %c0_52] : memref<32x32xf32, #tpu.memory_space<vmem>>, vector<32x32xf32>
    %114 = arith.truncf %113 : vector<32x32xf32> to vector<32x32xbf16>
    %cst_53 = arith.constant dense<0.000000e+00> : vector<16x32xf32>
    %115 = tpu.matmul %112, %114, %cst_53 {dimension_numbers = #tpu.dot_dimension_numbers<[1], [0], [0], [1], [0, 0, 1, 1], [], []>} : vector<16x32xbf16>, vector<32x32xbf16>, vector<16x32xf32> -> vector<16x32xf32>
    %c0_54 = arith.constant 0 : index
    %c0_55 = arith.constant 0 : index
    %116 = vector.load %arg11[%c0_54, %c0_55] : memref<1x32xf32, #tpu.memory_space<vmem>>, vector<1x32xf32>
    %117 = vector.shape_cast %116 : vector<1x32xf32> to vector<32xf32>
    %118 = vector.shape_cast %117 : vector<32xf32> to vector<1x32xf32>
    %119 = vector.broadcast %118 : vector<1x32xf32> to vector<16x32xf32>
    %120 = arith.addf %115, %119 : vector<16x32xf32>
    %121 = vector.shape_cast %120 : vector<16x32xf32> to vector<2x8x32xf32>
    %c0_56 = arith.constant 0 : index
    %c0_57 = arith.constant 0 : index
    %c0_58 = arith.constant 0 : index
    %122 = vector.load %arg12[%c0_56, %c0_57, %c0_58] : memref<2x8x32xf32, #tpu.memory_space<vmem>>, vector<2x8x32xf32>
    tpu.vector_store %arg12[%c0_56, %c0_57, %c0_58], %121 {strides = array<i32>} : memref<2x8x32xf32, #tpu.memory_space<vmem>>, vector<2x8x32xf32>,
    return
  }
  func.func @transform_0(%arg0: i32) -> (i32, i32, i32) {
    %c0_i32 = arith.constant 0 : i32
    %c0_i32_0 = arith.constant 0 : i32
    %c0_i32_1 = arith.constant 0 : i32
    return %arg0, %c0_i32, %c0_i32_0 : i32, i32, i32
  }
  func.func @transform_1(%arg0: i32) -> (i32, i32, i32) {
    %c0_i32 = arith.constant 0 : i32
    %c0_i32_0 = arith.constant 0 : i32
    %c0_i32_1 = arith.constant 0 : i32
    return %arg0, %c0_i32, %c0_i32_0 : i32, i32, i32
  }
  func.func @transform_2(%arg0: i32) -> (i32, i32, i32) {
    %c0_i32 = arith.constant 0 : i32
    %c0_i32_0 = arith.constant 0 : i32
    %c0_i32_1 = arith.constant 0 : i32
    return %arg0, %c0_i32, %c0_i32_0 : i32, i32, i32
  }
  func.func @transform_3(%arg0: i32) -> (i32, i32) {
    %c0_i32 = arith.constant 0 : i32
    %c0_i32_0 = arith.constant 0 : i32
    %c0_i32_1 = arith.constant 0 : i32
    return %c0_i32, %c0_i32_0 : i32, i32
  }
  func.func @transform_4(%arg0: i32) -> (i32, i32) {
    %c0_i32 = arith.constant 0 : i32
    %c0_i32_0 = arith.constant 0 : i32
    %c0_i32_1 = arith.constant 0 : i32
    return %c0_i32, %c0_i32_0 : i32, i32
  }
  func.func @transform_5(%arg0: i32) -> (i32, i32) {
    %c0_i32 = arith.constant 0 : i32
    %c0_i32_0 = arith.constant 0 : i32
    %c0_i32_1 = arith.constant 0 : i32
    return %c0_i32, %c0_i32_0 : i32, i32
  }
  func.func @transform_6(%arg0: i32) -> (i32, i32) {
    %c0_i32 = arith.constant 0 : i32
    %c0_i32_0 = arith.constant 0 : i32
    %c0_i32_1 = arith.constant 0 : i32
    return %c0_i32, %c0_i32_0 : i32, i32
  }
  func.func @transform_7(%arg0: i32) -> (i32, i32) {
    %c0_i32 = arith.constant 0 : i32
    %c0_i32_0 = arith.constant 0 : i32
    %c0_i32_1 = arith.constant 0 : i32
    return %c0_i32, %c0_i32_0 : i32, i32
  }
  func.func @transform_8(%arg0: i32) -> (i32, i32) {
    %c0_i32 = arith.constant 0 : i32
    %c0_i32_0 = arith.constant 0 : i32
    %c0_i32_1 = arith.constant 0 : i32
    return %c0_i32, %c0_i32_0 : i32, i32
  }
  func.func @transform_9(%arg0: i32) -> (i32, i32) {
    %c0_i32 = arith.constant 0 : i32
    %c0_i32_0 = arith.constant 0 : i32
    %c0_i32_1 = arith.constant 0 : i32
    return %c0_i32, %c0_i32_0 : i32, i32
  }
  func.func @transform_10(%arg0: i32) -> (i32, i32) {
    %c0_i32 = arith.constant 0 : i32
    %c0_i32_0 = arith.constant 0 : i32
    %c0_i32_1 = arith.constant 0 : i32
    return %c0_i32, %c0_i32_0 : i32, i32
  }
  func.func @transform_11(%arg0: i32) -> (i32, i32, i32) {
    %c0_i32 = arith.constant 0 : i32
    %c0_i32_0 = arith.constant 0 : i32
    %c0_i32_1 = arith.constant 0 : i32
    return %arg0, %c0_i32, %c0_i32_0 : i32, i32, i32
  }
  func.func @transform_12(%arg0: i32) -> (i32, i32, i32, i32) {
    %c0_i32 = arith.constant 0 : i32
    %c0_i32_0 = arith.constant 0 : i32
    %c0_i32_1 = arith.constant 0 : i32
    %c0_i32_2 = arith.constant 0 : i32
    return %arg0, %c0_i32, %c0_i32_0, %c0_i32_1 : i32, i32, i32, i32
  }
}

</mosaic_0001>

<bundles_post_ra>
// kernel: tpu_custom_call.1
= control target key start
LH: loop header
LB: loop body
LE: loop exit
PB: predicated region body
PF: predicated region fallthrough
CT: control target
= control target key end

     0   :  { %s4773_s0 = inlined_call_operand.hbm [shape: f32[4,8,32], index: 0, kind: input, shape index: {}]   ;;  %s4774_s1 = inlined_call_operand.hbm [shape: f32[4,16,32], index: 1, kind: input, shape index: {}]   ;;  %s4775_s2 = inlined_call_operand.hbm [shape: f32[4,1,16], index: 2, kind: input, shape index: {}]   ;;  %s4776_s3 = inlined_call_operand.hbm [shape: f32[32,32], index: 3, kind: input, shape index: {}]   ;;  %s4777_s4 = inlined_call_operand.vmem [shape: f32[1,32], index: 4, kind: input, shape index: {}]   ;;  %s4778_s5 = inlined_call_operand.hbm [shape: f32[32,32], index: 5, kind: input, shape index: {}]   ;;  %s4779_s6 = inlined_call_operand.vmem [shape: f32[1,32], index: 6, kind: input, shape index: {}]   ;;  %s4780_s7 = inlined_call_operand.hbm [shape: f32[32,32], index: 7, kind: input, shape index: {}]   ;;  %s4781_s8 = inlined_call_operand.vmem [shape: f32[1,32], index: 8, kind: input, shape index: {}]   ;;  %s4782_s9 = inlined_call_operand.hbm [shape: f32[32,32], index: 9, kind: input, shape index: {}]   ;;  %s4783_s10 = inlined_call_operand.vmem [shape: f32[1,32], index: 10, kind: input, shape index: {}]   ;;  %s4784_s11 = inlined_call_operand.hbm [shape: f32[4,8,32], index: 11, kind: output, shape index: {0}]   ;;  %s4785_s12 = inlined_call_operand.hbm [shape: f32[4,4,8,16], index: 12, kind: output, shape index: {1}]  }
   0x1   :  { %4798 = sst [smem:[#allocation29_spill]] %s4774_s1 }
   0x2   :  { %4799 = sst [smem:[#allocation30_spill]] %s4776_s3 }
   0x3   :  { %4800 = sst [smem:[#allocation31_spill]] %s4778_s5 }
   0x4   :  { %4801 = sst [smem:[#allocation32_spill]] %s4780_s7 }
   0x5   :  { %4802 = sst [smem:[#allocation33_spill]] %s4782_s9 }
   0x6   :  { %4803 = sst [smem:[#allocation34_spill]] %s4783_s10 }
   0x7   :  { %4804 = sst [smem:[#allocation35_spill]] %s4784_s11 }
   0x8   :  { %4805 = sst [smem:[#allocation36_spill]] %s4785_s12 }
   0x9   :  { %18 = vsyncpa [#allocation4], 0 }
   0xa   :  { %20 = vsyncpa [#allocation4 + $0x1], 0 }
   0xb   :  { %21 = vsyncpa [#allocation7], 0 }
   0xc   :  { %23 = vsyncpa [#allocation7 + $0x1], 0 }
   0xd   :  { %24 = vsyncpa [#allocation10], 0 }
   0xe   :  { %25 = vsyncpa [#allocation13], 0 }
   0xf   :  { %26 = vsyncpa [#allocation5], 0 }
  0x10   :  { %28 = vsyncpa [#allocation5 + $0x1], 0 }
  0x11   :  { %29 = vsyncpa [#allocation17], 0 }
  0x12   :  { %31 = vsyncpa [#allocation17 + $0x1], 0  ;;  %s3639_s21 = smov 0   ;;  %s3641_s22 = smov 0  }
  0x13   :  { %s3643_s23 = smov 0   ;;  %s3645_s24 = smov 0  }
  0x14 LB: > { %4806 = sst [smem:[#allocation24_spill]] %s3542_s21  ;;  %s3660_s25 = sadd.s32 4294967295, %s3554_s24   ;;  %s3554_s24 = sphi %s3645_s24, %s4838_s24   ;;  %s3550_s23 = sphi %s3643_s23, %s4840_s23   ;;  %s3546_s22 = sphi %s3641_s22, %s4842_s22   ;;  %s3542_s21 = sphi %s3639_s21, %s4841_s21  }
  0x15   : > { %4807 = sst [smem:[#allocation25_spill]] %s3550_s23  ;;  %s2953_s26 = sadd.s32 4294967294, %s3554_s24  }
  0x16   : > { %p57_p0 = scmp.ne.s32.totalorder %s3546_s22, %s3542_s21  ;;  %p4796_p1 = scmp.eq.s32.totalorder %s3660_s25, 0 }
  0x17   : > { %p301_p2 = scmp.eq.s32.totalorder %s3660_s25, 1  ;;  %p307_p3 = scmp.eq.s32.totalorder %s2953_s26, 1 }
  0x18   : > { %p3669_p4 = por %p4796_p1, %p57_p0  ;;  %p2954_p5 = scmp.ge.s32.totalorder %s3554_s24, 1 }
  0x19   : > { %p3674_p6 = por %p307_p3, %p57_p0  ;;  %p340_p7 = scmp.lt.s32.totalorder %s3554_s24, 3 }
  0x1a   : > { %s4811_s3 = sld [smem:[#allocation30_spill]]  ;;  %s3556_s15 = smov [#allocation9]  }
  0x1b   : > { %s4809_s28 = scalar_select %p3674_p6, 1, 0 }
  0x1c   : > { %p3682_p8 = pnand %p2954_p5, %p340_p7  ;;  %s353_s16 = sshll.u32 %s3556_s15, 4  ;;  %s354_s16 = int_to_ptr.vmem [resolvable:$true] %s353_s16 }
  0x1d   : > { %4810 = sst [smem:[#allocation26_spill]] %s4809_s28  ;;  %s4786_s26 = smov 128  }
  0x1e   : > { %p3047_p9 = pneg %p3682_p8  ;;  %s4814_s7 = sld [smem:[#allocation32_spill]] }
  0x1f   : > { %s4788_s29 = smov 8   ;;  %s3559_s30 = smov [#allocation12]  }
  0x20   : > { %s351_s13 = sshll.u32 %s4811_s3, 4  ;;  %p3690_p10 = pnand %p3047_p9, %p4796_p1  ;;  %s352_s13 = int_to_ptr.hbm [resolvable:$true] %s351_s13 }
  0x21   : > { %s387_s15 = sshll.u32 %s3559_s30, 4  ;;  %s3709_s18 = sadd.s32 1, %s3554_s24   ;;  %s388_s15 = int_to_ptr.vmem [resolvable:$true] %s387_s15 }
  0x22   : > { %3050 = dma.hbm_to_vmem [thread:$0]  (!%p3690_p10), %s352_s13, 512, %s354_s16, [#allocation10], %s4786_s26, %s4786_s26, %s4788_s29  }
  0x23   : > { %4815 = sst [smem:[#allocation27_spill]] %s3709_s18  ;;  %s44_s19 = sadd.s32 1, %s3550_s23 }
  0x24   : > { %s385_s20 = sshll.u32 %s4814_s7, 4  ;;  %s41_s3 = ssub.s32 %s3554_s24, %s3709_s18  ;;  %s386_s20 = int_to_ptr.hbm [resolvable:$true] %s385_s20 }
  0x25   : > { %3056 = dma.hbm_to_vmem [thread:$0]  (!%p3690_p10), %s386_s20, 512, %s388_s15, [#allocation13], %s4786_s26, %s4786_s26, %s4788_s29  }
  0x26   : > { %p51_p12 = scmp.ne.s32.totalorder %s3550_s23, %s3546_s22  ;;  %p42_p13 = scmp.eq.s32.totalorder %s41_s3, 0 }
  0x27   : > { %p52_p0 = scmp.eq.s32.totalorder %s3554_s24, 0  ;;  %p3081_p5 = scmp.lt.s32.totalorder %s3554_s24, 2 }
  0x28   : > { %p3719_p3 = por %p301_p2, %p51_p12  ;;  %s3728_s30 = sand.u32 1, %s3550_s23  }
  0x29   : > { %s3725_s16 = scalar_select %p42_p13, %s3550_s23, %s44_s19  }
  0x2a   : > { %p53_p7 = por %p52_p0, %p51_p12  ;;  %s443_s20 = sand.u32 1, %s3554_s24  }
  0x2b   : > { %4817 = sst [smem:[#allocation28_spill]] %s3725_s16  ;;  %s2963_s15 = sshll.u32 %s3728_s30, 5 }
  0x2c   : > { %p3732_p9 = pnand %p3081_p5, %p53_p7  ;;  %s3017_s3 = sshll.u32 %s3554_s24, 5 }
  0x2d   : > { %s4819_s1 = sld [smem:[#allocation29_spill]]  ;;  %s447_s19 = scalar_lea.vmem [#allocation6], %s2963_s15 }
  0x2e   : > { %s456_s16 = sshll.u32 %s447_s19, 4  ;;  %s3740_s23 = scalar_lea.sflag [#allocation7], %s443_s20  ;;  %s457_s16 = int_to_ptr.vmem [resolvable:$true] %s456_s16 }
  0x2f   : > { %p3298_p12 = pneg %p3732_p9 }
  0x33   : > { %s453_s18 = scalar_lea.hbm %s4819_s1, %s3017_s3  ;;  %s3301_s29 = scalar_lea.hbm %s4819_s1, 64 }
  0x34   : > { %s454_s28 = sshll.u32 %s453_s18, 4  ;;  %s455_s28 = int_to_ptr.hbm [resolvable:$true] %s454_s28 }
  0x35   : > { %s3294_s21 = sshra.s32 %s455_s28, 4  ;;  %s3295_s21 = int_to_ptr.hbm [resolvable:$true] %s3294_s21 }
  0x36   : > { %s3296_s11 = scalar_lea.hbm %s3295_s21, 32  ;;  %p3302_p5 = scmp.lt.s32.totalorder %s3295_s21, %s4819_s1 }
  0x37   : > { %p3297_p2 = scmp.ne.s32.totalorder %s3295_s21, %s3296_s11  ;;  %p3303_p7 = scmp.lt.s32.totalorder %s3301_s29, %s3296_s11 }
  0x39   : > { %p3299_p13 = pnand %p3298_p12, %p3297_p2  ;;  %p3304_p11 = por %p3303_p7, %p3302_p5 }
  0x3b   : > { %p3300_p0 = pneg %p3299_p13 }
  0x3d   : > { %p3305_p1 = pnand %p3304_p11, %p3300_p0 }
  0x3f   : > { %3308 = shalt.err (!%p3305_p1)
}
  0x40   : > { %s4820_s20 = smov 8   ;;  %s4821_s3 = smov 128  }
  0x41   : > { %3066 = dma.hbm_to_vmem [thread:$0]  (!%p3732_p9), %s455_s28, 512, %s457_s16, %s3740_s23, %s4821_s3, %s4821_s3, %s4820_s20  }
  0x42   : > { %s4822_s5 = sld [smem:[#allocation31_spill]]  ;;  %s3560_s11 = smov [#allocation11]  }
  0x43   : > { %s370_s21 = sshll.u32 %s3560_s11, 4  ;;  %s4823_s9 = sld [smem:[#allocation33_spill]]  ;;  %s371_s21 = int_to_ptr.vmem [resolvable:$true] %s370_s21 }
  0x44   : > { %s3561_s28 = smov [#allocation14]   ;;  %s2960_s10 = sshll.u32 %s3728_s30, 4 }
  0x45   : > { %s404_s16 = sshll.u32 %s3561_s28, 4  ;;  %s3015_s19 = sshll.u32 %s3554_s24, 4  ;;  %s405_s16 = int_to_ptr.vmem [resolvable:$true] %s404_s16 }
  0x46   : > { %s430_s18 = scalar_lea.hbm %s4773_s0, %s3015_s19  ;;  %s425_s1 = scalar_lea.vmem [#allocation3], %s2960_s10 }
  0x48   : > { %s368_s7 = sshll.u32 %s4822_s5, 4  ;;  %s433_s5 = sshll.u32 %s425_s1, 4  ;;  %s369_s7 = int_to_ptr.hbm [resolvable:$true] %s368_s7  ;;  %s434_s5 = int_to_ptr.vmem [resolvable:$true] %s433_s5 }
  0x49   : > { %s402_s15 = sshll.u32 %s4823_s9, 4  ;;  %s431_s9 = sshll.u32 %s430_s18, 4  ;;  %s403_s15 = int_to_ptr.hbm [resolvable:$true] %s402_s15  ;;  %s432_s9 = int_to_ptr.hbm [resolvable:$true] %s431_s9 }
  0x4a   : > { %3053 = dma.hbm_to_vmem [thread:$0]  (!%p3690_p10), %s369_s7, 512, %s371_s21, [#allocation10], %s4821_s3, %s4821_s3, %s4820_s20  }
  0x4b   : > { %3059 = dma.hbm_to_vmem [thread:$0]  (!%p3690_p10), %s403_s15, 512, %s405_s16, [#allocation13], %s4821_s3, %s4821_s3, %s4820_s20  }
  0x4c   : > { %s2967_s7 = sshll.u32 %s3728_s30, 1  ;;  %s422_s21 = scalar_lea.sflag [#allocation4], %s3728_s30 }
  0x4d   : > { %s3384_s28 = sshra.s32 %s432_s9, 4  ;;  %s3391_s16 = scalar_lea.hbm %s4773_s0, 32  ;;  %s3385_s28 = int_to_ptr.hbm [resolvable:$true] %s3384_s28 }
  0x4e   : > { %s3386_s12 = scalar_lea.hbm %s3385_s28, 16  ;;  %p3392_p2 = scmp.lt.s32.totalorder %s3385_s28, %s4773_s0 }
  0x4f   : > { %p3387_p1 = scmp.ne.s32.totalorder %s3385_s28, %s3386_s12  ;;  %p3393_p13 = scmp.lt.s32.totalorder %s3391_s16, %s3386_s12 }
  0x51   : > { %p3389_p11 = pnand %p3387_p1, %p3298_p12  ;;  %p3394_p0 = por %p3393_p13, %p3392_p2 }
  0x53   : > { %p3390_p10 = pneg %p3389_p11 }
  0x55   : > { %p3395_p5 = pnand %p3394_p0, %p3390_p10 }
  0x57   : > { %3398 = shalt.err (!%p3395_p5)
}
  0x58   : > { %3063 = dma.hbm_to_vmem [thread:$0]  (!%p3732_p9), %s432_s9, 256, %s434_s5, %s422_s21, %s4821_s3, %s4821_s3, %s4820_s20  }
  0x59   : > { %s2968_s1 = sshll.u32 %s3554_s24, 1  ;;  %s470_s18 = scalar_lea.vmem [#allocation8], %s2967_s7 }
  0x5a   : > { %s474_s29 = scalar_lea.hbm %s4775_s2, %s2968_s1  ;;  %s477_s17 = sshll.u32 %s470_s18, 4  ;;  %s478_s17 = int_to_ptr.vmem [resolvable:$true] %s477_s17 }
  0x5b   : > { %s475_s28 = sshll.u32 %s474_s29, 4  ;;  %s3421_s9 = scalar_lea.hbm %s4775_s2, 4  ;;  %s476_s28 = int_to_ptr.hbm [resolvable:$true] %s475_s28 }
  0x5c   : > { %s3414_s12 = sshra.s32 %s476_s28, 4  ;;  %s3415_s12 = int_to_ptr.hbm [resolvable:$true] %s3414_s12 }
  0x5d   : > { %s3416_s15 = scalar_lea.hbm %s3415_s12, 2  ;;  %p3422_p10 = scmp.lt.s32.totalorder %s3415_s12, %s4775_s2 }
  0x5e   : > { %p3417_p7 = scmp.ne.s32.totalorder %s3415_s12, %s3416_s15  ;;  %p3423_p2 = scmp.lt.s32.totalorder %s3421_s9, %s3416_s15 }
  0x60   : > { %p3419_p1 = pnand %p3417_p7, %p3298_p12  ;;  %p3424_p13 = por %p3423_p2, %p3422_p10 }
  0x62   : > { %p3420_p11 = pneg %p3419_p1 }
  0x64   : > { %p3425_p0 = pnand %p3424_p13, %p3420_p11 }
  0x66   : > { %3428 = shalt.err (!%p3425_p0)
}
  0x67   : > { %s3562_s7 = smov 16   ;;  %s3563_s21 = smov 1  }
  0x68   : > { %3069 = dma.hbm_to_vmem [thread:$0]  (!%p3732_p9), %s476_s28, 32, %s478_s17, %s3740_s23, %s3562_s7, %s3562_s7, %s3563_s21  }
  0x69   : > { %489 = sbr.rel (%p3682_p8) target bundleno = 1695 (0x69f), region = 64  ;;  %s3815_s19 = sand.u32 (!%p3682_p8), 1, %s3546_s22  }
  0x6a   : > { %s2970_s10 = sshll.u32 (!%p3682_p8), %s3815_s19, 4  ;;  %s492_s1 = scalar_lea.sflag (!%p3682_p8), [#allocation4], %s3815_s19 }
  0x6b   : > { %s495_s30 = scalar_lea.vmem (!%p3682_p8), [#allocation3], %s2970_s10 }
  0x6e   : > { %3517 = dma.done.wait (%p3669_p4), %s492_s1, 256  }
  0x6f   : > { %3519 = vsyncadd (%p3669_p4), %s492_s1, 4294967040  ;;  %s501_s23 = sand.u32 1, %s3660_s25   ;;  %s2971_s14 = sshll.u32 %s3815_s19, 5 }
  0x70   : > { %s502_s26 = scalar_lea.sflag [#allocation7], %s501_s23  ;;  %s3827_s11 = scalar_lea.vmem [#allocation6], %s2971_s14 }
  0x71   : > { %3521 = dma.done.wait (%p3669_p4), %s502_s26, 544  }
  0x72   : > { %3523 = vsyncadd (%p3669_p4), %s502_s26, 4294966752  ;;  %s2972_s29 = sshll.u32 %s3815_s19, 1  ;;  %p4824_p8 = scmp.eq.s32.totalorder %s3660_s25, 0 }
  0x73   : > { %s3834_s18 = scalar_lea.vmem [#allocation8], %s2972_s29 }
  0x74   : > { %3525 = dma.done.wait (%p4824_p8), [#allocation10], 1024   ;;  %p4825_p9 = pmov %p4824_p8 }
  0x75   : > { %p4826_p12 = pmov %p4824_p8 }
  0x76   : > { %3527 = vsyncadd (%p4825_p9), [#allocation10], 4294966272 }
  0x77   : > { %3529 = dma.done.wait (%p4826_p12), [#allocation13], 1024   ;;  %p4827_p5 = pmov %p4824_p8 }
  0x78   : > { %v609_v0 = vld [vmem:[#allocation9 + $0x10] sm:$0xff]  ;;  %v610_v1 = vld [vmem:[#allocation9 + $0x18] sm:$0xff]  ;;  %v607_v5 = vld [vmem:[#allocation9] sm:$0xff]  ;;  %vm617_vm0 = vcmask 261120   ;;  %s3564_s28 = smov 112   ;;  %s3565_s16 = smov 104  }
  0x79   : > { %3531 = vsyncadd (%p4827_p5), [#allocation13], 4294966272  ;;  %v637_v2 = vld [vmem:[#allocation11 + $0x10] sm:$0xff]  ;;  %v612_v3 = vpack.c.bf16 %v610_v1, %v609_v0  ;;  %v638_v4 = vld [vmem:[#allocation11 + $0x18] sm:$0xff]  ;;  %s3566_s5 = smov 120   ;;  %vm720_vm1 = vcmask 1047556  }
  0x7a   : > { %v608_v6 = vld [vmem:[#allocation9 + $0x8] sm:$0xff]  ;;  %v640_v7 = vpack.c.bf16 %v638_v4, %v637_v2  ;;  %v635_v8 = vld [vmem:[#allocation11] sm:$0xff]  ;;  %v672_v16 = vld [vmem:[#allocation12 + $0x10] sm:$0xff]  ;;  %v3567_v43 = vmov 1983009808   ;;  %vm1655_vm2 = vcmask 64512  }
  0x7b   : > { %v636_v9 = vld [vmem:[#allocation11 + $0x8] sm:$0xff]  ;;  %627 = vmatpush.bf16.msra.mxu0 %v612_v3  ;;  %v611_v11 = vpack.c.bf16 %v608_v6, %v607_v5  ;;  %v601_v13 = vld [vmem:[%s3827_s11] sm:$0xff]  ;;  %v604_v34 = vld [vmem:[%s3827_s11 + $0x18] sm:$0xff]  ;;  %v725_v44 = vunpack.c.l.s4 %v3567_v43  ;;  %v3568_v63 = vmov 1934713408   ;;  %vm1760_vm5 = vcmask 130048  }
  0x7c   : > { %v598_v10 = vld [vmem:[%s495_s30] sm:$0xff]  ;;  %v599_v12 = vld [vmem:[%s495_s30 + $0x8] sm:$0xff]  ;;  %657 = vmatpush.bf16.msra.mxu1 %v640_v7  ;;  %v639_v15 = vpack.c.bf16 %v636_v9, %v635_v8  ;;  %v749_v0 = vunpack.c.l.s4 %v3568_v63  ;;  %s2978_s3 = sshll.u32 %s3815_s19, 6  ;;  %s3570_s30 = smov 8   ;;  %vm2025_vm8 = vcmask 195584  }
  0x7d   : > { %v602_v14 = vld [vmem:[%s3827_s11 + $0x8] sm:$0xff]  ;;  %v673_v17 = vld [vmem:[#allocation12 + $0x18] sm:$0xff]  ;;  %v600_v21 = vpack.c.bf16 %v599_v12, %v598_v10  ;;  %v3852_v24 = vld [vmem:[%s4777_s4] ss:$0 sm:$0xff]  ;;  %v3891_v47 = vunpack.c.0.s8 %v725_v44  ;;  %s4419_s7 = scalar_lea.vmem [#allocation16], %s2978_s3  ;;  %s3571_s23 = smov 16  }
  0x7e   : > { %v670_v18 = vld [vmem:[#allocation12] sm:$0xff]  ;;  %v675_v19 = vpack.c.bf16 %v673_v17, %v672_v16  ;;  %v671_v20 = vld [vmem:[#allocation12 + $0x8] sm:$0xff]  ;;  %v605_v22 = vpack.c.bf16 %v602_v14, %v601_v13  ;;  %v3913_v14 = vunpack.c.0.s8 %v749_v0  ;;  %s3572_s14 = smov 24   ;;  %s3020_s26 = sshll.u32 %s3660_s25, 6 }
  0x7f   : > { %628 = vmatpush.bf16.msra.mxu0 %v611_v11  ;;  %v674_v23 = vpack.c.bf16 %v671_v20, %v670_v18  ;;  %v3859_v28 = vld [vmem:[%s4779_s6] ss:$0 sm:$0xff]  ;;  %s2763_s17 = sshll.u32 %s4419_s7, 4  ;;  %s2733_s12 = scalar_lea.sflag [#allocation17], %s3815_s19  ;;  %s2764_s17 = int_to_ptr.vmem [resolvable:$true] %s2763_s17 }
  0x80   : > { %686 = vmatpush.bf16.msra.mxu2 %v675_v19  ;;  %658 = vmatpush.bf16.msra.mxu1 %v639_v15  ;;  %v603_v33 = vld [vmem:[%s3827_s11 + $0x10] sm:$0xff] }
  0x81   : > { %v606_v35 = vpack.c.bf16 %v604_v34, %v603_v33  ;;  %v3199_v37 = vld [vmem:[%s4781_s8] ss:$0 sm:$0xff] }
  0x82   : > { %2979 = vmatmul.msk.bf16.vlgmr.msra.gmra.mxu0 %vm617_vm0, %v600_v21 }
  0x83   : > { %2980 = vmatmul.msk.bf16.vlgmr.msra.gmra.mxu1 %vm617_vm0, %v605_v22 }
  0x84   : > { %687 = vmatpush.bf16.msra.mxu2 %v674_v23 }
  0x87   : > { %2982 = vmatmul.msk.bf16.vlgmr.msra.gmra.mxu2 %vm617_vm0, %v605_v22 }
  0x93   : > { %2981 = vmatmul.msk.bf16.gmra.mxu1 %vm617_vm0, %v606_v35 }
  0x97   : > { %2983 = vmatmul.msk.bf16.gmra.mxu2 %vm617_vm0, %v606_v35 }
  0xff   : > { %v630_v25 = vpop.f32.mrf.mxu0 }
 0x100   : > { %v631_v26 = vadd.f32 %v3852_v24, %v630_v25  ;;  %v660_v27 = vpop.f32.mrf.mxu1 }
 0x101   : > { %v3862_v30 = vadd.f32 %v3859_v28, %v660_v27 }
 0x102   : > { %707 = vrot.lane.b32.xlu2 %v631_v26, %s3564_s28  ;;  %v722_v46 = vrot.slane %v631_v26, 4 }
 0x103   : > { %v874_v10 = vrot.slane %v3862_v30, 4 }
 0x108   : > { %v662_v29 = vpop.f32.mrf.mxu1 }
 0x109   : > { %v3865_v31 = vadd.f32 %v3859_v28, %v662_v29 }
 0x10a   : > { %713 = vrot.lane.b32.xlu2 %v631_v26, %s3565_s16  ;;  %v689_v36 = vpop.f32.mrf.mxu2 }
 0x10b   : > { %v3147_v32 = vpack.i.bf16 %v3865_v31, %v3862_v30  ;;  %v3881_v38 = vadd.f32 %v3199_v37, %v689_v36  ;;  %v930_v9 = vrot.slane %v3865_v31, 4 }
 0x10d   : > { %3148 = vrot.lane.b32.xlu1 %v3147_v32, %s3565_s16  ;;  %3138 = vrot.lane.b32.xlu0 %v3147_v32, %s3566_s5 }
 0x112   : > { %v691_v39 = vpop.f32.mrf.mxu2 }
 0x113   : > { %v3883_v40 = vadd.f32 %v3199_v37, %v691_v39 }
 0x115   : > { %3143 = vrot.lane.b32.xlu0 %v3147_v32, %s3564_s28  ;;  %701 = vrot.lane.b32.xlu1 %v631_v26, %s3566_s5  ;;  %v3887_v41 = vpack.i.bf16 %v3883_v40, %v3881_v38 }
 0x11d   : > { %3158 = vrot.lane.b32.xlu1 %v3887_v41, %s3564_s28  ;;  %3153 = vrot.lane.b32.xlu0 %v3887_v41, %s3566_s5 }
 0x15c   : > { %v708_v42 = vpop.permute.xlu2 %707 }
 0x15d   : > { %v719_v45 = vrot.slane %v708_v42, 4  ;;  %v723_v49 = vsel %vm720_vm1, %v708_v42, %v722_v46 }
 0x15e   : > { %v3899_v61 = vperm.slane %v723_v49, %v3891_v47 }
 0x15f   : > { %v721_v48 = vsel %vm720_vm1, %v719_v45, %v631_v26 }
 0x160   : > { %v3896_v60 = vperm.slane %v721_v48, %v3891_v47  ;;  %v758_v12 = vrot.slane %v3899_v61, 4 }
 0x162   : > { %v746_v11 = vrot.slane %v3896_v60, 4 }
 0x164   : > { %v714_v62 = vpop.permute.xlu2 %713 }
 0x165   : > { %v732_v8 = vrot.slane %v714_v62, 4 }
 0x17f   : > { %v3149_v50 = vpop.permute.xlu1 %3148  ;;  %v3139_v51 = vpop.permute.xlu0 %3138 }
 0x180   : > { %v3151_v52 = vunpack.i.h.bf16 %v3149_v50  ;;  %v3150_v53 = vunpack.i.l.bf16 %v3149_v50  ;;  %v3141_v54 = vunpack.i.h.bf16 %v3139_v51  ;;  %v3140_v55 = vunpack.i.l.bf16 %v3139_v51 }
 0x182   : > { %v940_v56 = vrot.slane %v3151_v52, 4  ;;  %v884_v57 = vrot.slane %v3150_v53, 4  ;;  %v942_v58 = vrot.slane %v3141_v54, 4  ;;  %v886_v59 = vrot.slane %v3140_v55, 4 }
 0x184   : > { %v941_v1 = vsel %vm720_vm1, %v940_v56, %v3141_v54  ;;  %v943_v2 = vsel %vm720_vm1, %v3151_v52, %v942_v58  ;;  %v885_v3 = vsel %vm720_vm1, %v884_v57, %v3140_v55  ;;  %v887_v4 = vsel %vm720_vm1, %v3150_v53, %v886_v59 }
 0x185   : > { %v947_v5 = vperm.slane %v941_v1, %v3891_v47  ;;  %v951_v6 = vperm.slane %v943_v2, %v3891_v47  ;;  %v891_v7 = vperm.slane %v885_v3, %v3891_v47  ;;  %v895_v13 = vperm.slane %v887_v4, %v3891_v47 }
 0x187   : > { %v3144_v15 = vpop.permute.xlu0 %3143  ;;  %v702_v16 = vpop.permute.xlu1 %701  ;;  %v952_v21 = vrot.slane %v947_v5, 4  ;;  %v964_v22 = vrot.slane %v951_v6, 4  ;;  %v896_v23 = vrot.slane %v891_v7, 4  ;;  %v908_v33 = vrot.slane %v895_v13, 4 }
 0x188   : > { %v3146_v17 = vunpack.i.h.bf16 %v3144_v15  ;;  %v3145_v18 = vunpack.i.l.bf16 %v3144_v15  ;;  %v733_v19 = vsel %vm720_vm1, %v732_v8, %v702_v16  ;;  %v734_v20 = vrot.slane %v702_v16, 4 }
 0x189   : > { %v739_v25 = vperm.slane %v733_v19, %v3891_v47 }
 0x18a   : > { %v928_v26 = vrot.slane %v3146_v17, 4  ;;  %v931_v27 = vsel %vm720_vm1, %v3146_v17, %v930_v9  ;;  %v872_v29 = vrot.slane %v3145_v18, 4  ;;  %v875_v32 = vsel %vm720_vm1, %v3145_v18, %v874_v10 }
 0x18b   : > { %v939_v34 = vperm.slane %v931_v27, %v3891_v47  ;;  %v883_v35 = vperm.slane %v875_v32, %v3891_v47  ;;  %v735_v36 = vsel %vm720_vm1, %v714_v62, %v734_v20  ;;  %v744_v43 = vrot.slane %v739_v25, 4 }
 0x18c   : > { %v929_v37 = vsel %vm720_vm1, %v928_v26, %v3865_v31  ;;  %v873_v39 = vsel %vm720_vm1, %v872_v29, %v3862_v30  ;;  %v743_v42 = vperm.slane %v735_v36, %v3891_v47  ;;  %v747_v31 = vsel %vm720_vm1, %v739_v25, %v746_v11 }
 0x18d   : > { %v935_v44 = vperm.slane %v929_v37, %v3891_v47  ;;  %v966_v45 = vrot.slane %v939_v34, 4  ;;  %v879_v46 = vperm.slane %v873_v39, %v3891_v47  ;;  %v909_v48 = vsel %vm720_vm1, %v908_v33, %v883_v35 }
 0x18e   : > { %v910_v49 = vrot.slane %v883_v35, 4  ;;  %v915_v50 = vperm.slane %v909_v48, %v3913_v14  ;;  %v965_v51 = vsel %vm720_vm1, %v964_v22, %v939_v34  ;;  %v745_v4 = vsel %vm720_vm1, %v744_v43, %v3896_v60 }
 0x18f   : > { %v954_v52 = vrot.slane %v935_v44, 4  ;;  %v897_v30 = vsel %vm720_vm1, %v896_v23, %v879_v46  ;;  %v898_v53 = vrot.slane %v879_v46, 4  ;;  %v953_v54 = vsel %vm720_vm1, %v952_v21, %v935_v44 }
 0x190   : > { %v903_v55 = vperm.slane %v897_v30, %v3913_v14  ;;  %v911_v56 = vsel %vm720_vm1, %v895_v13, %v910_v49  ;;  %v924_v57 = vrot.slane %v915_v50, 4  ;;  %v959_v58 = vperm.slane %v953_v54, %v3913_v14 }
 0x191   : > { %v899_v59 = vsel %vm720_vm1, %v891_v7, %v898_v53  ;;  %v919_v62 = vperm.slane %v911_v56, %v3913_v14  ;;  %v955_v63 = vsel %vm720_vm1, %v947_v5, %v954_v52  ;;  %v967_v0 = vsel %vm720_vm1, %v951_v6, %v966_v45 }
 0x192   : > { %v907_v1 = vperm.slane %v899_v59, %v3913_v14  ;;  %v920_v2 = vrot.slane %v903_v55, 4  ;;  %v963_v3 = vperm.slane %v955_v63, %v3913_v14  ;;  %v971_v9 = vperm.slane %v965_v51, %v3913_v14 }
 0x193   : > { %v926_v8 = vrot.slane %v919_v62, 4  ;;  %v975_v10 = vperm.slane %v967_v0, %v3913_v14  ;;  %v976_v7 = vrot.slane %v959_v58, 4  ;;  %v925_v5 = vsel %vm720_vm1, 0.0, %v924_v57 }
 0x194   : > { %v921_v11 = vsel %vm720_vm1, 0.0, %v920_v2  ;;  %v922_v13 = vrot.slane %v907_v1, 4  ;;  %v978_v6 = vrot.slane %v963_v3, 4  ;;  %v980_v16 = vrot.slane %v971_v9, 4 }
 0x195   : > { %v927_v15 = vsel %vm720_vm1, 0.0, %v926_v8  ;;  %v982_v17 = vrot.slane %v975_v10, 4  ;;  %v751_v18 = vperm.slane %v745_v4, %v3913_v14  ;;  %v977_v19 = vsel %vm720_vm1, 0.0, %v976_v7 }
 0x196   : > { %v923_v60 = vsel %vm720_vm1, 0.0, %v922_v13  ;;  %v979_v20 = vsel %vm720_vm1, 0.0, %v978_v6  ;;  %v1434_v21 = vrot.slane %v927_v15, 4  ;;  %v981_v22 = vsel %vm720_vm1, 0.0, %v980_v16 }
 0x197   : > { %v983_v23 = vsel %vm720_vm1, 0.0, %v982_v17  ;;  %v1423_v25 = vrot.slane %v923_v60, 4  ;;  %v1429_v26 = vsel %vm720_vm1, %v926_v8, %v915_v50  ;;  %v1477_v29 = vrot.slane %v979_v20, 4 }
 0x198   : > { %v1435_v27 = vsel %vm720_vm1, %v1434_v21, %v925_v5  ;;  %v1488_v32 = vrot.slane %v983_v23, 4  ;;  %v755_v33 = vperm.slane %v747_v31, %v3913_v14  ;;  %v756_v34 = vrot.slane %v743_v42, 4 }
 0x199   : > { %v759_v35 = vsel %vm720_vm1, %v743_v42, %v758_v12  ;;  %v768_v36 = vrot.slane %v751_v18, 4  ;;  %v1418_v37 = vsel %vm720_vm1, %v922_v13, %v903_v55  ;;  %v1483_v39 = vsel %vm720_vm1, %v982_v17, %v971_v9 }
 0x19a   : > { %v1489_v43 = vsel %vm720_vm1, %v1488_v32, %v981_v22  ;;  %v767_v44 = vperm.slane %v759_v35, %v3913_v14  ;;  %v770_v45 = vrot.slane %v755_v33, 4  ;;  %v757_v46 = vsel %vm720_vm1, %v756_v34, %v3899_v61 }
 0x19b   : > { %v769_v48 = vsel %vm720_vm1, 0.0, %v768_v36  ;;  %v1422_v49 = vperm.slane %v1418_v37, %v3891_v47  ;;  %v1424_v50 = vsel %vm720_vm1, %v1423_v25, %v921_v11  ;;  %v3973_v12 = vperm.slane %v757_v46, %v3913_v14 }
 0x19c   : > { %v771_v42 = vsel %vm720_vm1, 0.0, %v770_v45  ;;  %v3976_v51 = vrot.slane %v767_v44, 4  ;;  %v1433_v31 = vperm.slane %v1429_v26, %v3891_v47  ;;  %v1428_v30 = vperm.slane %v1424_v50, %v3891_v47 }
 0x19d   : > { %v1365_v52 = vrot.slane %v771_v42, 4  ;;  %v1439_v61 = vperm.slane %v1435_v27, %v3891_v47  ;;  %v1472_v53 = vsel %vm720_vm1, %v978_v6, %v959_v58  ;;  %v772_v54 = vrot.slane %v3973_v12, 4 }
 0x19e   : > { %v3985_v55 = vsel %vm720_vm1, 0.0, %v3976_v51  ;;  %v3988_v56 = vsel %vm720_vm1, %v770_v45, %v751_v18  ;;  %v1478_v57 = vsel %vm720_vm1, %v1477_v29, %v977_v19  ;;  %v1440_v62 = vrot.slane %v1428_v30, 4 }
 0x19f   : > { %v3992_v59 = vsel %vm720_vm1, %v1365_v52, %v769_v48  ;;  %v1452_v63 = vrot.slane %v1439_v61, 4  ;;  %v1476_v0 = vperm.slane %v1472_v53, %v3891_v47  ;;  %v1376_v58 = vrot.slane %v3985_v55, 4 }
 0x1a0   : > { %v1482_v1 = vperm.slane %v1478_v57, %v3891_v47  ;;  %v1487_v2 = vperm.slane %v1483_v39, %v3891_v47  ;;  %v1493_v3 = vperm.slane %v1489_v43, %v3891_v47  ;;  %v4000_v4 = vsel %vm720_vm1, 0.0, %v772_v54 }
 0x1a1   : > { %v1441_v8 = vsel %vm720_vm1, %v1440_v62, %v1422_v49  ;;  %v1453_v9 = vsel %vm720_vm1, %v1452_v63, %v1433_v31  ;;  %v1442_v10 = vrot.slane %v1422_v49, 4  ;;  %v1454_v15 = vrot.slane %v1433_v31, 4 }
 0x1a2   : > { %v1447_v7 = vperm.slane %v1441_v8, %v3913_v14  ;;  %v1459_v11 = vperm.slane %v1453_v9, %v3913_v14  ;;  %v1494_v13 = vrot.slane %v1482_v1, 4  ;;  %v1506_v5 = vrot.slane %v1493_v3, 4 }
 0x1a3   : > { %v1443_v6 = vsel %vm720_vm1, %v1428_v30, %v1442_v10  ;;  %v1496_v16 = vrot.slane %v1476_v0, 4  ;;  %v1508_v17 = vrot.slane %v1487_v2, 4  ;;  %v1455_v23 = vsel %vm720_vm1, %v1439_v61, %v1454_v15 }
 0x1a4   : > { %v1464_v18 = vrot.slane %v1459_v11, 4  ;;  %v1495_v60 = vsel %vm720_vm1, %v1494_v13, %v1476_v0  ;;  %v1507_v19 = vsel %vm720_vm1, %v1506_v5, %v1487_v2  ;;  %v1451_v20 = vperm.slane %v1443_v6, %v3913_v14 }
 0x1a5   : > { %v1501_v21 = vperm.slane %v1495_v60, %v3913_v14  ;;  %v1513_v22 = vperm.slane %v1507_v19, %v3913_v14  ;;  %v1497_v25 = vsel %vm720_vm1, %v1482_v1, %v1496_v16  ;;  %v1463_v27 = vperm.slane %v1455_v23, %v3913_v14 }
 0x1a6   : > { %v1465_v26 = vsel %vm720_vm1, %v1464_v18, %v1447_v7  ;;  %v1470_v29 = vrot.slane %v1451_v20, 4  ;;  %v1505_v32 = vperm.slane %v1497_v25, %v3913_v14  ;;  %v1509_v35 = vsel %vm720_vm1, %v1493_v3, %v1508_v17 }
 0x1a7   : > { %v1518_v33 = vrot.slane %v1513_v22, 4  ;;  %v1526_v34 = vpack.c.bf16 %v1465_v26, %v1465_v26  ;;  %v1466_v36 = vrot.slane %v1447_v7, 4  ;;  %v1468_v37 = vrot.slane %v1463_v27, 4 }
 0x1a8   : > { %v1517_v39 = vperm.slane %v1509_v35, %v3913_v14  ;;  %v1524_v43 = vrot.slane %v1505_v32, 4  ;;  %v1520_v44 = vrot.slane %v1501_v21, 4  ;;  %v1471_v49 = vsel %vm720_vm1, %v1463_v27, %v1470_v29 }
 0x1a9   : > { %v1519_v45 = vsel %vm720_vm1, %v1518_v33, %v1501_v21  ;;  %v1652_v46 = vunpack.c.l.b16 %v1526_v34  ;;  %v1467_v48 = vsel %vm720_vm1, %v1459_v11, %v1466_v36  ;;  %v1469_v42 = vsel %vm720_vm1, %v1468_v37, %v1451_v20 }
 0x1aa   : > { %v1527_v50 = vpack.c.bf16 %v1519_v45, %v1519_v45  ;;  %v1522_v31 = vrot.slane %v1517_v39, 4  ;;  %v1521_v52 = vsel %vm720_vm1, %v1513_v22, %v1520_v44  ;;  %v1530_v30 = vpack.c.bf16 %v1469_v42, %v1469_v42  ;;  %v665_v44 = vpop.f32.mrf.mxu1 }
 0x1ab   : > { %v1528_v61 = vpack.c.bf16 %v1467_v48, %v1467_v48  ;;  %v1529_v53 = vpack.c.bf16 %v1521_v52, %v1521_v52  ;;  %v1525_v54 = vsel %vm720_vm1, %v1517_v39, %v1524_v43  ;;  %v1532_v63 = vpack.c.bf16 %v1471_v49, %v1471_v49 }
 0x1ac   : > { %v1653_v57 = vunpack.c.l.b16 %v1527_v50  ;;  %v1523_v62 = vsel %vm720_vm1, %v1522_v31, %v1505_v32  ;;  %v1533_v0 = vpack.c.bf16 %v1525_v54, %v1525_v54  ;;  %v1701_v2 = vunpack.c.l.b16 %v1530_v30 }
 0x1ad   : > { %v1531_v1 = vpack.c.bf16 %v1523_v62, %v1523_v62  ;;  %v1677_v3 = vunpack.c.l.b16 %v1528_v61  ;;  %v1678_v8 = vunpack.c.l.b16 %v1529_v53  ;;  %v1725_v10 = vunpack.c.l.b16 %v1532_v63  ;;  %v1751_v61 = vld [vmem:[%s3834_s18] sm:$0x1]  ;;  %v632_v53 = vpop.f32.mrf.mxu0 }
 0x1ae   : > { %v1654_v9 = vpack.c.b16 %v1653_v57, %v1652_v46  ;;  %v1726_v7 = vunpack.c.l.b16 %v1533_v0  ;;  %v1364_v5 = vperm.slane %v3988_v56, %v3891_v47  ;;  %v1370_v6 = vperm.slane %v3992_v59, %v3891_v47 }
 0x1af   : > { %v1702_v11 = vunpack.c.l.b16 %v1531_v1  ;;  %v1679_v13 = vpack.c.b16 %v1678_v8, %v1677_v3  ;;  %v1371_v17 = vsel %vm720_vm1, %v3976_v51, %v3973_v12  ;;  %v1377_v18 = vsel %vm720_vm1, %v1376_v58, %v4000_v4 }
 0x1b0   : > { %v1660_v15 = vsel %vm1655_vm2, %v1654_v9, 0  ;;  %v1727_v16 = vpack.c.b16 %v1726_v7, %v1725_v10  ;;  %v1381_v56 = vperm.slane %v1377_v18, %v3891_v47  ;;  %v1382_v20 = vrot.slane %v1370_v6, 4 }
 0x1b1   : > { %1669 = vmatpush.bf16.xpose.msra.mxu3 %v1660_v15  ;;  %v1703_v60 = vpack.c.b16 %v1702_v11, %v1701_v2  ;;  %v1684_v19 = vsel %vm1655_vm2, %v1679_v13, 0  ;;  %v1375_v12 = vperm.slane %v1371_v17, %v3891_v47  ;;  %v1384_v25 = vrot.slane %v1364_v5, 4 }
 0x1b2   : > { %1693 = vmatpush.bf16.xpose.msrb.mxu0 %v1684_v19  ;;  %v1732_v59 = vsel %vm1655_vm2, %v1727_v16, 0  ;;  %v1383_v51 = vsel %vm720_vm1, %v1382_v20, %v1364_v5  ;;  %v1394_v55 = vrot.slane %v1381_v56, 4  ;;  %v667_v42 = vpop.f32.mrf.mxu1  ;;  %v4062_v31 = vadd.f32 %v3859_v28, %v665_v44 }
 0x1b3   : > { %v1708_v21 = vsel %vm1655_vm2, %v1703_v60, 0  ;;  %v1389_v58 = vperm.slane %v1383_v51, %v3913_v14  ;;  %v1396_v29 = vrot.slane %v1375_v12, 4  ;;  %v1385_v35 = vsel %vm720_vm1, %v1370_v6, %v1384_v25  ;;  %v4107_v51 = vpop.permute.xlu0 %3153 }
 0x1b4   : > { %v1395_v4 = vsel %vm720_vm1, %v1394_v55, %v1375_v12  ;;  %v1393_v37 = vperm.slane %v1385_v35, %v3913_v14  ;;  %v4065_v52 = vadd.f32 %v3859_v28, %v667_v42  ;;  %vm1752_vm3 = vcmp.eq.f32.partialorder %v1751_v61, 0.0 }
 0x1b5   : > { %v1401_v22 = vperm.slane %v1395_v4, %v3913_v14  ;;  %v1408_v23 = vrot.slane %v1389_v58, 4  ;;  %v1397_v36 = vsel %vm720_vm1, %v1381_v56, %v1396_v29  ;;  %v3569_v54 = vmov 0  }
 0x1b6   : > { %v1405_v39 = vperm.slane %v1397_v36, %v3913_v14  ;;  %v1412_v43 = vrot.slane %v1393_v37, 4  ;;  %v3167_v30 = vpack.i.bf16 %v4065_v52, %v4062_v31  ;;  %v1753_v57 = vsel %vm1752_vm3, 1, %v3569_v54 }
 0x1b7   : > { %v1406_v26 = vrot.slane %v1401_v22, 4  ;;  %v1409_v27 = vsel %vm720_vm1, %v1401_v22, %v1408_v23  ;;  %v1754_v62 = vperm.slane %v1753_v57, 0  ;;  %v4097_v20 = vadd.f32 %v3852_v24, %v632_v53 }
 0x1b8   : > { %v1415_v32 = vpack.c.bf16 %v1409_v27, %v1409_v27  ;;  %v1410_v45 = vrot.slane %v1405_v39, 4  ;;  %v1413_v46 = vsel %vm720_vm1, %v1405_v39, %v1412_v43  ;;  %3168 = vrot.lane.b32.xlu0 %v3167_v30, %s3566_s5  ;;  %v1194_v29 = vrot.slane %v3883_v40, 4 }
 0x1b9   : > { %1717 = vmatpush.bf16.xpose.msrb.mxu3 %v1708_v21  ;;  %v1407_v33 = vsel %vm720_vm1, %v1406_v26, %v1389_v58  ;;  %v1417_v49 = vpack.c.bf16 %v1413_v46, %v1413_v46  ;;  %vm4073_vm4 = vcmp.eq.s32.totalorder %v1754_v62, 1  ;;  %v1042_v62 = vrot.slane %v4065_v52, 4 }
 0x1ba   : > { %1741 = vmatpush.bf16.xpose.msra.mxu0 %v1732_v59  ;;  %v1414_v34 = vpack.c.bf16 %v1407_v33, %v1407_v33  ;;  %v1411_v48 = vsel %vm720_vm1, %v1410_v45, %v1393_v37  ;;  %v3159_v59 = vpop.permute.xlu1 %3158 }
 0x1bb   : > { %2985 = vmatmul.msk.bf16.vlgmr.msrb.gmra.mxu0 %vm1655_vm2, %v1415_v32  ;;  %v1416_v50 = vpack.c.bf16 %v1411_v48, %v1411_v48  ;;  %v3161_v27 = vunpack.i.h.bf16 %v3159_v59  ;;  %v3160_v32 = vunpack.i.l.bf16 %v3159_v59 }
 0x1bc   : > { %2984 = vmatmul.msk.bf16.vlgmr.msra.gmra.mxu3 %vm1655_vm2, %v1414_v34  ;;  %v1138_v34 = vrot.slane %v3881_v38, 4 }
 0x1bd   : > { %v1192_v35 = vrot.slane %v3161_v27, 4  ;;  %v1195_v37 = vsel %vm720_vm1, %v3161_v27, %v1194_v29  ;;  %v1136_v39 = vrot.slane %v3160_v32, 4 }
 0x1be   : > { %v1139_v46 = vsel %vm720_vm1, %v3160_v32, %v1138_v34 }
 0x1bf   : > { %v1193_v42 = vsel %vm720_vm1, %v1192_v35, %v3883_v40  ;;  %v1137_v53 = vsel %vm720_vm1, %v1136_v39, %v3881_v38 }
 0x1c0   : > { %3178 = vrot.lane.b32.xlu0 %v3167_v30, %s3565_s16  ;;  %v4141_v38 = vperm.slane %v1137_v53, %v3891_v47 }
 0x1c2   : > { %v1162_v35 = vrot.slane %v4141_v38, 4 }
 0x1cb   : > { %2987 = vmatmul.msk.bf16.vlgmr.msra.gmra.mxu0 %vm1655_vm2, %v1417_v49 }
 0x1cc   : > { %2986 = vmatmul.msk.bf16.vlgmr.msrb.gmra.mxu3 %vm1655_vm2, %v1416_v50 }
 0x22a   : > { %v3169_v23 = vpop.permute.xlu0 %3168 }
 0x22b   : > { %v3171_v43 = vunpack.i.h.bf16 %v3169_v23  ;;  %v3170_v45 = vunpack.i.l.bf16 %v3169_v23 }
 0x22d   : > { %v1054_v57 = vrot.slane %v3171_v43, 4  ;;  %v998_v0 = vrot.slane %v3170_v45, 4 }
 0x232   : > { %v3179_v36 = vpop.permute.xlu0 %3178 }
 0x233   : > { %v3180_v48 = vunpack.i.l.bf16 %v3179_v36  ;;  %v3181_v61 = vunpack.i.h.bf16 %v3179_v36 }
 0x235   : > { %v996_v40 = vrot.slane %v3180_v48, 4 }
 0x238   : > { %v1695_v63 = vpop.f32.mrf.mxu0 }
 0x239   : > { %v1748_v28 = vmul.f32 0.35355338, %v1695_v63  ;;  %v4132_v63 = vperm.slane %v1139_v46, %v3891_v47 }
 0x23b   : > { %v1757_v1 = vsel %vm4073_vm4, -inf, %v1748_v28 }
 0x23c   : > { %v1764_v2 = vsel %vm1760_vm5, %v1757_v1, -inf }
 0x23d   : > { %1765 = vmax.xlane.f32.xlu1 %v1764_v2 }
 0x23f   : > { %v1671_v3 = vpop.f32.mrf.mxu3 }
 0x240   : > { %v1697_v8 = vpop.f32.mrf.mxu0  ;;  %v1747_v9 = vmul.f32 0.35355338, %v1671_v3 }
 0x242   : > { %v1756_v10 = vsel %vm4073_vm4, -inf, %v1747_v9  ;;  %v1052_v9 = vrot.slane %v3181_v61, 4 }
 0x243   : > { %v1761_v7 = vsel %vm1760_vm5, %v1756_v10, -inf }
 0x244   : > { %1762 = vmax.xlane.f32.xlu2 %v1761_v7  ;;  %v3156_v7 = vunpack.i.h.bf16 %v4107_v51 }
 0x247   : > { %v1673_v11 = vpop.f32.mrf.mxu3 }
 0x248   : > { %v1743_v13 = vpop.f32.mrf.mxu0  ;;  %v1055_v11 = vsel %vm720_vm1, %v3181_v61, %v1054_v57 }
 0x249   : > { %v1750_v5 = vmul.f32 0.35355338, %v1743_v13 }
 0x24b   : > { %v4085_v6 = vsel %vm4073_vm4, -inf, %v1750_v5 }
 0x24c   : > { %v1770_v15 = vsel %vm1760_vm5, %v4085_v6, -inf }
 0x24d   : > { %1771 = vmax.xlane.f32.xlu2 %v1770_v15  ;;  %v1174_v15 = vrot.slane %v4132_v63, 4 }
 0x24f   : > { %v1719_v16 = vpop.f32.mrf.mxu3 }
 0x250   : > { %v1745_v17 = vpop.f32.mrf.mxu0  ;;  %v1749_v18 = vmul.f32 0.35355338, %v1719_v16  ;;  %v999_v16 = vsel %vm720_vm1, %v3180_v48, %v998_v0 }
 0x252   : > { %v4091_v60 = vsel %vm4073_vm4, -inf, %v1749_v18 }
 0x253   : > { %v1767_v19 = vsel %vm1760_vm5, %v4091_v60, -inf }
 0x254   : > { %1768 = vmax.xlane.f32.xlu0 %v1767_v19 }
 0x256   : > { %3173 = vrot.lane.b32.xlu1 %v3167_v30, %s3564_s28  ;;  %v4126_v30 = vperm.slane %v1195_v37, %v3891_v47 }
 0x257   : > { %v1721_v56 = vpop.f32.mrf.mxu3 }
 0x258   : > { %v1230_v8 = vrot.slane %v4126_v30, 4  ;;  %v997_v56 = vsel %vm720_vm1, %v996_v40, %v3170_v45 }
 0x25e   : > { %703 = vrot.lane.b32.xlu1 %v4097_v20, %s3566_s5 }
 0x265   : > { %3163 = vrot.lane.b32.xlu2 %v3887_v41, %s3565_s16 }
 0x268   : > { %709 = vrot.lane.b32.xlu0 %v4097_v20, %s3564_s28 }
 0x270   : > { %715 = vrot.lane.b32.xlu0 %v4097_v20, %s3565_s16 }
 0x2b0   : > { %v1766_v21 = vpop.xlane.xlu1 %1765 }
 0x2b1   : > { %v1774_v12 = vsub.f32 %v1757_v1, %v1766_v21  ;;  %v4136_v1 = vperm.slane %v1193_v42, %v3891_v47 }
 0x2b3   : > { %v1779_v55 = vmul.f32 1.442695, %v1774_v12  ;;  %v1218_v19 = vrot.slane %v4136_v1, 4  ;;  %v3155_v12 = vunpack.i.l.bf16 %v4107_v51 }
 0x2b5   : > { %3201 = vpow2.f32 %v1779_v55  ;;  %v1053_v55 = vsel %vm720_vm1, %v1052_v9, %v3171_v43  ;;  %v1150_v36 = vrot.slane %v3155_v12, 4 }
 0x2b6   : > { %v1059_v29 = vperm.slane %v1053_v55, %v3891_v47 }
 0x2b7   : > { %v1763_v24 = vpop.xlane.xlu2 %1762 }
 0x2b8   : > { %v1773_v58 = vsub.f32 %v1756_v10, %v1763_v24  ;;  %v986_v24 = vrot.slane %v4062_v31, 4  ;;  %v1064_v61 = vrot.slane %v1059_v29, 4 }
 0x2ba   : > { %v1777_v22 = vmul.f32 1.442695, %v1773_v58  ;;  %v1206_v58 = vrot.slane %v3156_v7, 4 }
 0x2bb   : > { %v4109_v4 = vpop.eup %3201 }
 0x2bc   : > { %v1788_v41 = vsel %vm1760_vm5, %v4109_v4, 0.0  ;;  %3203 = vpow2.f32 %v1777_v22  ;;  %v1007_v22 = vperm.slane %v999_v16, %v3891_v47 }
 0x2bd   : > { %1789 = vadd.xlane.f32.xlu1 %v1788_v41 }
 0x2be   : > { %v1020_v42 = vrot.slane %v1007_v22, 4 }
 0x2c0   : > { %v1772_v25 = vpop.xlane.xlu2 %1771 }
 0x2c1   : > { %v1776_v13 = vsub.f32 %v4085_v6, %v1772_v25  ;;  %v1063_v6 = vperm.slane %v1055_v11, %v3891_v47  ;;  %v1003_v25 = vperm.slane %v997_v56, %v3891_v47 }
 0x2c2   : > { %v4113_v26 = vpop.eup %3203 }
 0x2c3   : > { %v1785_v33 = vsel %vm1760_vm5, %v4113_v26, 0.0  ;;  %v1783_v41 = vmul.f32 1.442695, %v1776_v13  ;;  %v1076_v37 = vrot.slane %v1063_v6, 4 }
 0x2c4   : > { %1786 = vadd.xlane.f32.xlu0 %v1785_v33 }
 0x2c5   : > { %3205 = vpow2.f32 %v1783_v41 }
 0x2c7   : > { %v1769_v10 = vpop.xlane.xlu0 %1768 }
 0x2c8   : > { %v3174_v44 = vpop.permute.xlu1 %3173  ;;  %v4121_v50 = vpop.permute.xlu2 %3163  ;;  %v1775_v59 = vsub.f32 %v4091_v60, %v1769_v10 }
 0x2c9   : > { %v3176_v49 = vunpack.i.h.bf16 %v3174_v44  ;;  %v3166_v28 = vunpack.i.h.bf16 %v4121_v50  ;;  %v3175_v3 = vunpack.i.l.bf16 %v3174_v44  ;;  %v3165_v44 = vunpack.i.l.bf16 %v4121_v50 }
 0x2ca   : > { %v1781_v32 = vmul.f32 1.442695, %v1775_v59 }
 0x2cb   : > { %v1043_v2 = vsel %vm720_vm1, %v3176_v49, %v1042_v62  ;;  %v1040_v5 = vrot.slane %v3176_v49, 4  ;;  %v1204_v18 = vrot.slane %v3166_v28, 4  ;;  %v984_v21 = vrot.slane %v3175_v3, 4  ;;  %v4183_v11 = vpop.eup %3205 }
 0x2cc   : > { %v1051_v17 = vperm.slane %v1043_v2, %v3891_v47  ;;  %v987_v60 = vsel %vm720_vm1, %v3175_v3, %v986_v24  ;;  %v1207_v34 = vsel %vm720_vm1, %v3166_v28, %v1206_v58  ;;  %v1008_v49 = vrot.slane %v1003_v25, 4 }
 0x2cd   : > { %v1041_v23 = vsel %vm720_vm1, %v1040_v5, %v4065_v52  ;;  %v1205_v51 = vsel %vm720_vm1, %v1204_v18, %v3156_v7  ;;  %v985_v33 = vsel %vm720_vm1, %v984_v21, %v4062_v31  ;;  %v995_v39 = vperm.slane %v987_v60, %v3891_v47 }
 0x2ce   : > { %v1078_v27 = vrot.slane %v1051_v17, 4  ;;  %v1047_v52 = vperm.slane %v1041_v23, %v3891_v47  ;;  %v1211_v43 = vperm.slane %v1205_v51, %v3891_v47  ;;  %v1077_v45 = vsel %vm720_vm1, %v1076_v37, %v1051_v17 }
 0x2cf   : > { %v991_v31 = vperm.slane %v985_v33, %v3891_v47  ;;  %v1215_v48 = vperm.slane %v1207_v34, %v3891_v47  ;;  %3207 = vpow2.f32 %v1781_v32  ;;  %v4177_v28 = vperm.slane %v1077_v45, %v3913_v14 }
 0x2d0   : > { %v1079_v46 = vsel %vm720_vm1, %v1063_v6, %v1078_v27  ;;  %v1066_v53 = vrot.slane %v1047_v52, 4  ;;  %v1216_v57 = vrot.slane %v1211_v43, 4  ;;  %v1219_v62 = vsel %vm720_vm1, %v1211_v43, %v1218_v19 }
 0x2d1   : > { %v1228_v0 = vrot.slane %v1215_v48, 4  ;;  %v1087_v50 = vperm.slane %v1079_v46, %v3913_v14  ;;  %v1231_v40 = vsel %vm720_vm1, %v1215_v48, %v1230_v8  ;;  %v1148_v2 = vrot.slane %v3165_v44, 4 }
 0x2d2   : > { %v1065_v3 = vsel %vm720_vm1, %v1064_v61, %v1047_v52  ;;  %v1009_v9 = vsel %vm720_vm1, %v1008_v49, %v991_v31  ;;  %v1010_v10 = vrot.slane %v991_v31, 4  ;;  %v1022_v7 = vrot.slane %v995_v39, 4 }
 0x2d3   : > { %v1217_v13 = vsel %vm720_vm1, %v1216_v57, %v4136_v1  ;;  %v1227_v5 = vperm.slane %v1219_v62, %v3913_v14  ;;  %v1239_v16 = vperm.slane %v1231_v40, %v3913_v14  ;;  %v1149_v17 = vsel %vm720_vm1, %v1148_v2, %v3155_v12 }
 0x2d4   : > { %v4191_v8 = vsel %vm720_vm1, %v1059_v29, %v1066_v53  ;;  %v4194_v18 = vsel %vm720_vm1, %v1020_v42, %v995_v39  ;;  %v1229_v19 = vsel %vm720_vm1, %v1228_v0, %v4126_v30  ;;  %v1155_v56 = vperm.slane %v1149_v17, %v3891_v47 }
 0x2d5   : > { %v4199_v59 = vpop.eup %3207  ;;  %v4202_v1 = vperm.slane %v1065_v3, %v3913_v14  ;;  %v1092_v21 = vrot.slane %v4177_v28, 4  ;;  %v4205_v55 = vrot.slane %v1087_v50, 4  ;;  %v1151_v12 = vsel %vm720_vm1, %v3165_v44, %v1150_v36 }
 0x2d6   : > { %v4209_v6 = vsel %vm720_vm1, %v1003_v25, %v1010_v10  ;;  %v4212_v24 = vperm.slane %v1009_v9, %v3913_v14  ;;  %v1023_v30 = vsel %vm720_vm1, %v1007_v22, %v1022_v7  ;;  %v1223_v58 = vperm.slane %v1217_v13, %v3913_v14 }
 0x2d7   : > { %v1075_v41 = vperm.slane %v4191_v8, %v3913_v14  ;;  %v1235_v23 = vperm.slane %v1229_v19, %v3913_v14  ;;  %v1242_v27 = vrot.slane %v1227_v5, 4  ;;  %v1246_v60 = vrot.slane %v1239_v16, 4 }
 0x2d8   : > { %v1159_v51 = vperm.slane %v1151_v12, %v3891_v47  ;;  %v1160_v29 = vrot.slane %v1155_v56, 4  ;;  %v1163_v25 = vsel %vm720_vm1, %v1155_v56, %v1162_v35  ;;  %v1791_v32 = vsel %vm1760_vm5, %v4199_v59, 0.0 }
 0x2d9   : > { %v4225_v22 = vsel %vm720_vm1, 0.0, %v4205_v55  ;;  %v1019_v33 = vperm.slane %v4209_v6, %v3913_v14  ;;  %v1031_v34 = vperm.slane %v1023_v30, %v3913_v14  ;;  %v1171_v36 = vperm.slane %v1163_v25, %v3913_v14  ;;  %1792 = vadd.xlane.f32.xlu2 %v1791_v32 }
 0x2da   : > { %v1240_v37 = vrot.slane %v1223_v58, 4  ;;  %v1161_v52 = vsel %vm720_vm1, %v1160_v29, %v4141_v38  ;;  %v1172_v35 = vrot.slane %v1159_v51, 4  ;;  %v1175_v39 = vsel %vm720_vm1, %v1159_v51, %v1174_v15 }
 0x2db   : > { %v1243_v43 = vsel %vm720_vm1, 0.0, %v1242_v27  ;;  %v1167_v44 = vperm.slane %v1161_v52, %v3913_v14  ;;  %v1183_v45 = vperm.slane %v1175_v39, %v3913_v14  ;;  %v1186_v46 = vrot.slane %v1171_v36, 4 }
 0x2dc   : > { %v1244_v31 = vrot.slane %v1235_v23, 4  ;;  %v1247_v48 = vsel %vm720_vm1, 0.0, %v1246_v60  ;;  %v1588_v49 = vsel %vm720_vm1, %v1242_v27, %v1223_v58  ;;  %v1173_v38 = vsel %vm720_vm1, %v1172_v35, %v4132_v63 }
 0x2dd   : > { %v1179_v42 = vperm.slane %v1173_v38, %v3913_v14  ;;  %v1184_v61 = vrot.slane %v1167_v44, 4  ;;  %v1187_v15 = vsel %vm720_vm1, 0.0, %v1186_v46  ;;  %v1190_v53 = vrot.slane %v1183_v45, 4 }
 0x2de   : > { %v1593_v57 = vrot.slane %v1243_v43, 4  ;;  %v1599_v62 = vsel %vm720_vm1, %v1246_v60, %v1235_v23  ;;  %v1534_v0 = vsel %vm720_vm1, %v1186_v46, %v1167_v44  ;;  %v1539_v50 = vrot.slane %v1187_v15, 4 }
 0x2df   : > { %v1185_v40 = vsel %vm720_vm1, 0.0, %v1184_v61  ;;  %v1188_v2 = vrot.slane %v1179_v42, 4  ;;  %v1191_v3 = vsel %vm720_vm1, 0.0, %v1190_v53  ;;  %v4250_v9 = vperm.slane %v1534_v0, %v3891_v47 }
 0x2e0   : > { %v1604_v63 = vrot.slane %v1247_v48, 4  ;;  %v1545_v10 = vsel %vm720_vm1, %v1190_v53, %v1179_v42  ;;  %v1550_v7 = vrot.slane %v1191_v3, 4  ;;  %v1794_v13 = vsel %vm1760_vm5, %v4183_v11, 0.0 }
 0x2e1   : > { %v1245_v5 = vsel %vm720_vm1, 0.0, %v1244_v31  ;;  %v1189_v16 = vsel %vm720_vm1, 0.0, %v1188_v2  ;;  %v4258_v17 = vperm.slane %v1545_v10, %v3891_v47  ;;  %1795 = vadd.xlane.f32.xlu2 %v1794_v13  ;;  %v1540_v8 = vsel %vm720_vm1, %v1539_v50, %v1185_v40 }
 0x2e2   : > { %v1038_v19 = vrot.slane %v1031_v34, 4  ;;  %v1241_v56 = vsel %vm720_vm1, 0.0, %v1240_v37  ;;  %v1551_v12 = vsel %vm720_vm1, %v1550_v7, %v1189_v16  ;;  %v1544_v6 = vperm.slane %v1540_v8, %v3891_v47  ;;  %v4318_v7 = vpop.permute.xlu0 %709 }
 0x2e3   : > { %v1603_v30 = vperm.slane %v1599_v62, %v3891_v47  ;;  %v1555_v58 = vperm.slane %v1551_v12, %v3891_v47  ;;  %v1570_v23 = vrot.slane %v4258_v17, 4  ;;  %v1558_v27 = vrot.slane %v4250_v9, 4 }
 0x2e4   : > { %v1088_v60 = vrot.slane %v4202_v1, 4  ;;  %v1027_v51 = vperm.slane %v4194_v18, %v3913_v14  ;;  %v1592_v29 = vperm.slane %v1588_v49, %v3891_v47  ;;  %v1605_v25 = vsel %vm720_vm1, %v1604_v63, %v1245_v5 }
 0x2e5   : > { %v1090_v32 = vrot.slane %v1075_v41, 4  ;;  %v1032_v34 = vrot.slane %v4212_v24, 4  ;;  %v1559_v36 = vsel %vm720_vm1, %v1544_v6, %v1558_v27  ;;  %v1594_v37 = vsel %vm720_vm1, %v1593_v57, %v1241_v56 }
 0x2e6   : > { %v2151_v52 = vsel %vm720_vm1, %v4205_v55, %v4177_v28  ;;  %v2156_v35 = vrot.slane %v4225_v22, 4  ;;  %v1039_v39 = vsel %vm720_vm1, 0.0, %v1038_v19  ;;  %v1571_v18 = vsel %vm720_vm1, %v1555_v58, %v1570_v23 }
 0x2e7   : > { %v1034_v43 = vrot.slane %v1019_v33, 4  ;;  %v1609_v44 = vperm.slane %v1605_v25, %v3891_v47  ;;  %v1624_v41 = vrot.slane %v1603_v30, 4  ;;  %v1579_v45 = vperm.slane %v1571_v18, %v3913_v14 }
 0x2e8   : > { %v1036_v46 = vrot.slane %v1027_v51, 4  ;;  %v1567_v31 = vperm.slane %v1559_v36, %v3913_v14  ;;  %v1598_v48 = vperm.slane %v1594_v37, %v3891_v47  ;;  %v1612_v49 = vrot.slane %v1592_v29, 4 }
 0x2e9   : > { %v4287_v55 = vsel %vm720_vm1, 0.0, %v1090_v32  ;;  %v1093_v22 = vsel %vm720_vm1, 0.0, %v1092_v21  ;;  %v2102_v38 = vrot.slane %v1039_v39, 4  ;;  %v1584_v33 = vrot.slane %v1579_v45, 4 }
 0x2ea   : > { %v4293_v42 = vsel %vm720_vm1, 0.0, %v1088_v60  ;;  %v4296_v61 = vperm.slane %v2151_v52, %v3891_v47  ;;  %v2157_v15 = vsel %vm720_vm1, %v2156_v35, %v1093_v22  ;;  %v2097_v53 = vsel %vm720_vm1, %v1038_v19, %v1027_v51 }
 0x2eb   : > { %v2140_v57 = vsel %vm720_vm1, %v1090_v32, %v4202_v1  ;;  %v1033_v62 = vsel %vm720_vm1, 0.0, %v1032_v34  ;;  %v1035_v28 = vsel %vm720_vm1, 0.0, %v1034_v43  ;;  %v1625_v21 = vsel %vm720_vm1, %v1609_v44, %v1624_v41 }
 0x2ec   : > { %v2145_v0 = vrot.slane %v4287_v55, 4  ;;  %v1037_v50 = vsel %vm720_vm1, 0.0, %v1036_v46  ;;  %v1585_v40 = vsel %vm720_vm1, %v1584_v33, %v1567_v31  ;;  %v1613_v2 = vsel %vm720_vm1, %v1598_v48, %v1612_v49 }
 0x2ed   : > { %v4310_v3 = vperm.slane %v2157_v15, %v3891_v47  ;;  %v2086_v1 = vsel %vm720_vm1, %v1034_v43, %v4212_v24  ;;  %v4315_v63 = vperm.slane %v2097_v53, %v3891_v47  ;;  %v2103_v10 = vsel %vm720_vm1, %v2102_v38, %v1037_v50 }
 0x2ee   : > { %v2091_v13 = vrot.slane %v1035_v28, 4  ;;  %v1621_v5 = vperm.slane %v1613_v2, %v3913_v14  ;;  %v1633_v16 = vperm.slane %v1625_v21, %v3913_v14  ;;  %v1646_v8 = vpack.c.bf16 %v1585_v40, %v1585_v40 }
 0x2ef   : > { %v1556_v19 = vrot.slane %v1544_v6, 4  ;;  %v1568_v56 = vrot.slane %v1555_v58, 4  ;;  %v1610_v12 = vrot.slane %v1598_v48, 4  ;;  %v1622_v23 = vrot.slane %v1609_v44, 4 }
 0x2f0   : > { %v4323_v27 = vperm.slane %v2103_v10, %v3891_v47  ;;  %v776_v24 = vrot.slane %v4318_v7, 4  ;;  %v1638_v60 = vrot.slane %v1633_v16, 4  ;;  %v1859_v51 = vunpack.c.l.b16 %v1646_v8 }
 0x2f1   : > { %v1557_v25 = vsel %vm720_vm1, %v1556_v19, %v4250_v9  ;;  %v1569_v32 = vsel %vm720_vm1, %v1568_v56, %v4258_v17  ;;  %v1611_v34 = vsel %vm720_vm1, %v1610_v12, %v1592_v29  ;;  %v1623_v6 = vsel %vm720_vm1, %v1622_v23, %v1603_v30 }
 0x2f2   : > { %v1639_v58 = vsel %vm720_vm1, %v1638_v60, %v1621_v5  ;;  %v1563_v36 = vperm.slane %v1557_v25, %v3913_v14  ;;  %v1575_v37 = vperm.slane %v1569_v32, %v3913_v14  ;;  %v1617_v52 = vperm.slane %v1611_v34, %v3913_v14 }
 0x2f3   : > { %v1647_v35 = vpack.c.bf16 %v1639_v58, %v1639_v58  ;;  %v1629_v39 = vperm.slane %v1623_v6, %v3913_v14  ;;  %v1586_v18 = vrot.slane %v1567_v31, 4  ;;  %v1640_v9 = vrot.slane %v1621_v5, 4 }
 0x2f4   : > { %v1580_v43 = vrot.slane %v1575_v37, 4  ;;  %v2090_v17 = vperm.slane %v2086_v1, %v3891_v47  ;;  %v2092_v29 = vsel %vm720_vm1, %v2091_v13, %v1033_v62  ;;  %v2122_v30 = vrot.slane %v4315_v63, 4 }
 0x2f5   : > { %v1860_v44 = vunpack.c.l.b16 %v1647_v35  ;;  %v1634_v41 = vrot.slane %v1629_v39, 4  ;;  %v1587_v46 = vsel %vm720_vm1, %v1579_v45, %v1586_v18  ;;  %v1641_v48 = vsel %vm720_vm1, %v1633_v16, %v1640_v9 }
 0x2f6   : > { %v1581_v49 = vsel %vm720_vm1, %v1580_v43, %v1563_v36  ;;  %v1648_v55 = vpack.c.bf16 %v1587_v46, %v1587_v46  ;;  %v1649_v22 = vpack.c.bf16 %v1641_v48, %v1641_v48  ;;  %v2096_v31 = vperm.slane %v2092_v29, %v3891_v47 }
 0x2f7   : > { %v1861_v38 = vpack.c.b16 %v1860_v44, %v1859_v51  ;;  %v1635_v33 = vsel %vm720_vm1, %v1634_v41, %v1617_v52  ;;  %v1642_v15 = vpack.c.bf16 %v1581_v49, %v1581_v49  ;;  %v2110_v53 = vrot.slane %v2090_v17, 4 }
 0x2f8   : > { %v1643_v62 = vpack.c.bf16 %v1635_v33, %v1635_v33  ;;  %v1881_v28 = vunpack.c.l.b16 %v1648_v55  ;;  %v1882_v21 = vunpack.c.l.b16 %v1649_v22  ;;  %v2123_v50 = vsel %vm720_vm1, %v4323_v27, %v2122_v30 }
 0x2f9   : > { %1873 = vmatpush.bf16.msra.mxu3 %v1861_v38  ;;  %v1815_v45 = vunpack.c.l.b16 %v1642_v15  ;;  %v2111_v40 = vsel %vm720_vm1, %v2096_v31, %v2110_v53  ;;  %v2131_v2 = vperm.slane %v2123_v50, %v3913_v14  ;;  %v2144_v1 = vperm.slane %v2140_v57, %v3891_v47  ;;  %v716_v38 = vpop.permute.xlu0 %715 }
 0x2fa   : > { %v1816_v10 = vunpack.c.l.b16 %v1643_v62  ;;  %v1883_v13 = vpack.c.b16 %v1882_v21, %v1881_v28  ;;  %v2119_v5 = vperm.slane %v2111_v40, %v3913_v14  ;;  %v2146_v16 = vsel %vm720_vm1, %v2145_v0, %v4293_v42 }
 0x2fb   : > { %v2136_v8 = vrot.slane %v2131_v2, 4  ;;  %v2150_v19 = vperm.slane %v2146_v16, %v3891_v47  ;;  %v2164_v56 = vrot.slane %v2144_v1, 4  ;;  %v2176_v12 = vrot.slane %v4296_v61, 4 }
 0x2fc   : > { %v1817_v23 = vpack.c.b16 %v1816_v10, %v1815_v45  ;;  %1895 = vmatpush.bf16.msrb.mxu0 %v1883_v13  ;;  %v1582_v60 = vrot.slane %v1563_v36, 4  ;;  %v1636_v51 = vrot.slane %v1617_v52, 4  ;;  %v2108_v25 = vrot.slane %v2096_v31, 4 }
 0x2fd   : > { %v2137_v57 = vsel %vm720_vm1, %v2136_v8, %v2119_v5  ;;  %v2165_v32 = vsel %vm720_vm1, %v2150_v19, %v2164_v56  ;;  %v2177_v34 = vsel %vm720_vm1, %v4310_v3, %v2176_v12  ;;  %v2120_v42 = vrot.slane %v4323_v27, 4 }
 0x2fe   : > { %1829 = vmatpush.bf16.msrb.mxu1 %v1817_v23  ;;  %v2173_v0 = vperm.slane %v2165_v32, %v3913_v14  ;;  %v2185_v6 = vperm.slane %v2177_v34, %v3913_v14  ;;  %v2198_v58 = vpack.c.bf16 %v2137_v57, %v2137_v57  ;;  %v1583_v35 = vsel %vm720_vm1, %v1575_v37, %v1582_v60 }
 0x2ff   : > { %v1637_v36 = vsel %vm720_vm1, %v1629_v39, %v1636_v51  ;;  %v1644_v52 = vpack.c.bf16 %v1583_v35, %v1583_v35  ;;  %v2109_v18 = vsel %vm720_vm1, %v2108_v25, %v2090_v17  ;;  %v2121_v9 = vsel %vm720_vm1, %v2120_v42, %v4315_v63 }
 0x300   : > { %v2190_v43 = vrot.slane %v2185_v6, 4  ;;  %v2368_v29 = vunpack.c.l.b16 %v2198_v58  ;;  %v1645_v30 = vpack.c.bf16 %v1637_v36, %v1637_v36  ;;  %v2115_v27 = vperm.slane %v2109_v18, %v3913_v14 }
 0x301   : > { %v1837_v44 = vunpack.c.l.b16 %v1644_v52  ;;  %v2127_v41 = vperm.slane %v2121_v9, %v3913_v14  ;;  %v2162_v46 = vrot.slane %v2150_v19, 4  ;;  %v2174_v48 = vrot.slane %v4310_v3, 4 }
 0x302   : > { %v2191_v37 = vsel %vm720_vm1, %v2190_v43, %v2173_v0  ;;  %v1838_v39 = vunpack.c.l.b16 %v1645_v30  ;;  %v2138_v49 = vrot.slane %v2119_v5, 4  ;;  %v2192_v55 = vrot.slane %v2173_v0, 4  ;;  %v704_v0 = vpop.permute.xlu1 %703 }
 0x303   : > { %v2199_v17 = vpack.c.bf16 %v2191_v37, %v2191_v37  ;;  %v2132_v22 = vrot.slane %v2127_v41, 4  ;;  %v2163_v63 = vsel %vm720_vm1, %v2162_v46, %v2144_v1  ;;  %v2175_v31 = vsel %vm720_vm1, %v2174_v48, %v4296_v61 }
 0x304   : > { %v1839_v33 = vpack.c.b16 %v1838_v39, %v1837_v44  ;;  %v2169_v15 = vperm.slane %v2163_v63, %v3913_v14  ;;  %v2181_v53 = vperm.slane %v2175_v31, %v3913_v14  ;;  %v2139_v3 = vsel %vm720_vm1, %v2131_v2, %v2138_v49 }
 0x305   : > { %v2369_v62 = vunpack.c.l.b16 %v2199_v17  ;;  %v2133_v28 = vsel %vm720_vm1, %v2132_v22, %v2115_v27  ;;  %v2193_v21 = vsel %vm720_vm1, %v2185_v6, %v2192_v55  ;;  %v2200_v50 = vpack.c.bf16 %v2139_v3, %v2139_v3 }
 0x306   : > { %1851 = vmatpush.bf16.msrb.mxu2 %v1839_v33  ;;  %v2186_v45 = vrot.slane %v2181_v53, 4  ;;  %v2194_v40 = vpack.c.bf16 %v2133_v28, %v2133_v28  ;;  %v2201_v1 = vpack.c.bf16 %v2193_v21, %v2193_v21  ;;  %v2134_v10 = vrot.slane %v2115_v27, 4 }
 0x307   : > { %v788_v61 = vrot.slane %v716_v38, 4  ;;  %v2370_v13 = vpack.c.b16 %v2369_v62, %v2368_v29  ;;  %v2392_v5 = vunpack.c.l.b16 %v2200_v50  ;;  %v2188_v16 = vrot.slane %v2169_v15, 4 }
 0x308   : > { %v2187_v8 = vsel %vm720_vm1, %v2186_v45, %v2169_v15  ;;  %v2320_v19 = vunpack.c.l.b16 %v2194_v40  ;;  %v2393_v56 = vunpack.c.l.b16 %v2201_v1  ;;  %v2135_v2 = vsel %vm720_vm1, %v2127_v41, %v2134_v10 }
 0x309   : > { %v2375_v12 = vsel %vm1655_vm2, %v2370_v13, 0  ;;  %v2195_v23 = vpack.c.bf16 %v2187_v8, %v2187_v8  ;;  %v2189_v60 = vsel %vm720_vm1, %v2181_v53, %v2188_v16  ;;  %v2196_v51 = vpack.c.bf16 %v2135_v2, %v2135_v2 }
 0x30a   : > { %2384 = vmatpush.bf16.xpose.msrb.mxu3 %v2375_v12  ;;  %v2394_v25 = vpack.c.b16 %v2393_v56, %v2392_v5  ;;  %v2197_v57 = vpack.c.bf16 %v2189_v60, %v2189_v60  ;;  %v777_v32 = vsel %vm720_vm1, %v776_v24, %v4097_v20  ;;  %v789_v35 = vsel %vm720_vm1, %v788_v61, %v704_v0 }
 0x30b   : > { %v2321_v34 = vunpack.c.l.b16 %v2195_v23  ;;  %v2344_v42 = vunpack.c.l.b16 %v2196_v51  ;;  %v783_v52 = vperm.slane %v777_v32, %v3891_v47  ;;  %v778_v9 = vrot.slane %v4097_v20, 4 }
 0x30c   : > { %v2399_v6 = vsel %vm1655_vm2, %v2394_v25, 0  ;;  %v2345_v58 = vunpack.c.l.b16 %v2197_v57  ;;  %v795_v29 = vperm.slane %v789_v35, %v3891_v47  ;;  %v790_v30 = vrot.slane %v704_v0, 4 }
 0x30d   : > { %v2322_v36 = vpack.c.b16 %v2321_v34, %v2320_v19  ;;  %2408 = vmatpush.bf16.xpose.msra.mxu0 %v2399_v6  ;;  %v779_v27 = vsel %vm720_vm1, %v4318_v7, %v778_v9  ;;  %v802_v44 = vrot.slane %v783_v52, 4 }
 0x30e   : > { %v2346_v18 = vpack.c.b16 %v2345_v58, %v2344_v42  ;;  %v791_v41 = vsel %vm720_vm1, %v716_v38, %v790_v30  ;;  %v787_v46 = vperm.slane %v779_v27, %v3891_v47  ;;  %v800_v48 = vrot.slane %v795_v29, 4 }
 0x30f   : > { %v2327_v43 = vsel %vm1655_vm2, %v2322_v36, 0  ;;  %v803_v20 = vsel %vm720_vm1, %v795_v29, %v802_v44  ;;  %v799_v37 = vperm.slane %v791_v41, %v3891_v47 }
 0x310   : > { %2336 = vmatpush.bf16.xpose.msra.mxu1 %v2327_v43  ;;  %v2351_v24 = vsel %vm1655_vm2, %v2346_v18, 0  ;;  %v811_v39 = vperm.slane %v803_v20, %v3913_v14  ;;  %v814_v49 = vrot.slane %v787_v46, 4  ;;  %v801_v55 = vsel %vm720_vm1, %v800_v48, %v783_v52 }
 0x311   : > { %2360 = vmatpush.bf16.xpose.msra.mxu2 %v2351_v24  ;;  %v812_v17 = vrot.slane %v799_v37, 4  ;;  %v807_v7 = vperm.slane %v801_v55, %v3913_v14 }
 0x312   : > { %v815_v22 = vsel %vm720_vm1, %v799_v37, %v814_v49  ;;  %v826_v63 = vrot.slane %v811_v39, 4 }
 0x313   : > { %v823_v31 = vperm.slane %v815_v22, %v3913_v14  ;;  %v813_v38 = vsel %vm720_vm1, %v812_v17, %v787_v46  ;;  %v824_v33 = vrot.slane %v807_v7, 4 }
 0x314   : > { %v827_v15 = vsel %vm720_vm1, 0.0, %v826_v63  ;;  %v819_v53 = vperm.slane %v813_v38, %v3913_v14  ;;  %v2028_v5 = vsel %vm720_vm1, %v826_v63, %v807_v7  ;;  %v694_v63 = vpop.f32.mrf.mxu2  ;;  %v3233_v38 = vld [vmem:[%s4781_s8] ss:$0 sm:$0xff] }
 0x315   : > { %v830_v3 = vrot.slane %v823_v31, 4  ;;  %v2033_v62 = vrot.slane %v827_v15, 4  ;;  %v825_v28 = vsel %vm720_vm1, 0.0, %v824_v33  ;;  %v2032_v2 = vperm.slane %v2028_v5, %v3891_v47 }
 0x316   : > { %v828_v21 = vrot.slane %v819_v53, 4  ;;  %v4457_v33 = vadd.f32 %v3233_v38, %v694_v63 }
 0x317   : > { %v831_v50 = vsel %vm720_vm1, 0.0, %v830_v3  ;;  %v2034_v40 = vsel %vm720_vm1, %v2033_v62, %v825_v28  ;;  %v2039_v51 = vsel %vm720_vm1, %v830_v3, %v819_v53  ;;  %v2052_v44 = vrot.slane %v2032_v2, 4  ;;  %v2996_v28 = vld [vmem:[%s3834_s18 + $0x1] sm:$0x1]  ;;  %s4832_s18 = sld [smem:[#allocation36_spill]] }
 0x318   : > { %v2044_v1 = vrot.slane %v831_v50, 4  ;;  %v829_v10 = vsel %vm720_vm1, 0.0, %v828_v21  ;;  %v2038_v61 = vperm.slane %v2034_v40, %v3891_v47  ;;  %v2043_v32 = vperm.slane %v2039_v51, %v3891_v47 }
 0x319   : > { %vm2420_vm6 = vcmp.eq.f32.partialorder %v2996_v28, 0.0 }
 0x31a   : > { %v2045_v16 = vsel %vm720_vm1, %v2044_v1, %v829_v10  ;;  %v2050_v8 = vrot.slane %v2038_v61, 4  ;;  %v2064_v29 = vrot.slane %v2043_v32, 4  ;;  %v2053_v37 = vsel %vm720_vm1, %v2038_v61, %v2052_v44 }
 0x31b   : > { %v2049_v12 = vperm.slane %v2045_v16, %v3891_v47  ;;  %v2061_v39 = vperm.slane %v2053_v37, %v3913_v14 }
 0x31c   : > { %v2051_v60 = vsel %vm720_vm1, %v2050_v8, %v2032_v2  ;;  %v696_v31 = vpop.f32.mrf.mxu2 }
 0x31d   : > { %v2057_v57 = vperm.slane %v2051_v60, %v3913_v14  ;;  %v2065_v41 = vsel %vm720_vm1, %v2049_v12, %v2064_v29  ;;  %v2080_v22 = vrot.slane %v2061_v39, 4  ;;  %v4459_v15 = vadd.f32 %v3233_v38, %v696_v31  ;;  %s2762_s27 = scalar_lea.hbm %s4832_s18, %s3020_s26  ;;  %s3464_s20 = scalar_lea.hbm %s4832_s18, 128 }
 0x31e   : > { %v2073_v48 = vperm.slane %v2065_v41, %v3913_v14 }
 0x31f   : > { %v2076_v6 = vrot.slane %v2057_v57, 4  ;;  %v4463_v53 = vpack.i.bf16 %v4459_v15, %v4457_v33 }
 0x320   : > { %v2078_v49 = vrot.slane %v2073_v48, 4  ;;  %v2081_v7 = vsel %vm720_vm1, %v2073_v48, %v2080_v22 }
 0x321   : > { %3183 = vrot.lane.b32.xlu0 %v4463_v53, %s3566_s5 }
 0x322   : > { %v2079_v55 = vsel %vm720_vm1, %v2078_v49, %v2061_v39 }
 0x323   : > { %v2084_v17 = vpack.c.bf16 %v2079_v55, %v2079_v55 }
 0x330   : > { %v1790_v45 = vpop.xlane.xlu1 %1789 }
 0x331   : > { %3209 = vrcp.f32 %v1790_v45  ;;  %v2421_v45 = vsel %vm2420_vm6, 1, %v3569_v54 }
 0x332   : > { %v2422_v40 = vperm.slane %v2421_v45, 0 }
 0x334   : > { %vm4469_vm7 = vcmp.eq.s32.totalorder %v2422_v40, 1 }
 0x337   : > { %v3210_v13 = vpop.eup %3209  ;;  %v1787_v56 = vpop.xlane.xlu0 %1786 }
 0x338   : > { %v1802_v19 = vmul.f32 %v3210_v13, %v4109_v4  ;;  %3211 = vrcp.f32 %v1787_v56  ;;  %v2062_v4 = vrot.slane %v2049_v12, 4 }
 0x33a   : > { %1806 = vst.msk [vmem:[%s4419_s7 + $0x8] sm:$0xff] %vm1760_vm5, %v1802_v19  ;;  %v1810_v23 = vpack.c.bf16 %v1802_v19, %v1802_v19  ;;  %v2063_v0 = vsel %vm720_vm1, %v2062_v4, %v2043_v32 }
 0x33b   : > { %v2069_v58 = vperm.slane %v2063_v0, %v3913_v14 }
 0x33c   : > { %2989 = vmatmul.msk.bf16.vlgmr.msrb.gmra.mxu2 %vm1760_vm5, %v1810_v23 }
 0x33d   : > { %v2077_v35 = vsel %vm720_vm1, %v2069_v58, %v2076_v6  ;;  %v2074_v52 = vrot.slane %v2069_v58, 4 }
 0x33e   : > { %v3212_v25 = vpop.eup %3211  ;;  %v2083_v36 = vpack.c.bf16 %v2077_v35, %v2077_v35 }
 0x33f   : > { %v1801_v34 = vmul.f32 %v3212_v25, %v4113_v26  ;;  %v2075_v18 = vsel %vm720_vm1, %v2074_v52, %v2057_v57 }
 0x340   : > { %v2082_v26 = vpack.c.bf16 %v2075_v18, %v2075_v18 }
 0x341   : > { %1805 = vst.msk [vmem:[%s4419_s7] sm:$0xff] %vm1760_vm5, %v1801_v34  ;;  %v1809_v42 = vpack.c.bf16 %v1801_v34, %v1801_v34 }
 0x343   : > { %2988 = vmatmul.msk.bf16.vlgmr.msrb.gmra.mxu1 %vm1760_vm5, %v1809_v42 }
 0x34c   : > { %2993 = vmatmul.msk.bf16.vlgmr.msra.gmra.mxu2 %vm1655_vm2, %v2083_v36  ;;  %v1793_v9 = vpop.xlane.xlu2 %1792 }
 0x34d   : > { %3213 = vrcp.f32 %v1793_v9 }
 0x353   : > { %2992 = vmatmul.msk.bf16.vlgmr.msra.gmra.mxu1 %vm1655_vm2, %v2082_v26  ;;  %v3214_v43 = vpop.eup %3213 }
 0x354   : > { %v1803_v24 = vmul.f32 %v3214_v43, %v4199_v59  ;;  %v1796_v30 = vpop.xlane.xlu2 %1795 }
 0x355   : > { %3215 = vrcp.f32 %v1796_v30 }
 0x356   : > { %1807 = vst.msk [vmem:[%s4419_s7 + $0x10] sm:$0xff] %vm1760_vm5, %v1803_v24  ;;  %v1811_v27 = vpack.c.bf16 %v1803_v24, %v1803_v24 }
 0x358   : > { %2990 = vmatmul.msk.bf16.vlgmr.msra.gmra.mxu3 %vm1760_vm5, %v1811_v27 }
 0x35b   : > { %v3216_v46 = vpop.eup %3215 }
 0x35c   : > { %v1804_v20 = vmul.f32 %v3216_v46, %v4183_v11  ;;  %v2085_v11 = vpack.c.bf16 %v2081_v7, %v2081_v7 }
 0x35e   : > { %1808 = vst.msk [vmem:[%s4419_s7 + $0x18] sm:$0xff] %vm1760_vm5, %v1804_v20  ;;  %v1812_v59 = vpack.c.bf16 %v1804_v20, %v1804_v20 }
 0x360   : > { %2991 = vmatmul.msk.bf16.vlgmr.msrb.gmra.mxu0 %vm1760_vm5, %v1812_v59 }
 0x368   : > { %2994 = vmatmul.msk.bf16.vlgmr.msrb.gmra.mxu3 %vm1655_vm2, %v2084_v17 }
 0x370   : > { %2995 = vmatmul.msk.bf16.vlgmr.msra.gmra.mxu0 %vm1655_vm2, %v2085_v11 }
 0x3bf   : > { %v1853_v3 = vpop.f32.mrf.mxu2 }
 0x3c0   : > { %v1831_v62 = vpop.f32.mrf.mxu1  ;;  %v1915_v60 = vrot.slane %v1853_v3, 4 }
 0x3c1   : > { %v1903_v12 = vrot.slane %v1831_v62, 4 }
 0x3c7   : > { %v1855_v21 = vpop.f32.mrf.mxu2 }
 0x3c8   : > { %v1833_v50 = vpop.f32.mrf.mxu1 }
 0x3cf   : > { %v2362_v1 = vpop.f32.mrf.mxu2 }
 0x3d0   : > { %v2415_v10 = vmul.f32 0.35355338, %v2362_v1  ;;  %v2338_v61 = vpop.f32.mrf.mxu1 }
 0x3d1   : > { %v2414_v5 = vmul.f32 0.35355338, %v2338_v61 }
 0x3d2   : > { %v4475_v16 = vsel %vm4469_vm7, -inf, %v2415_v10 }
 0x3d3   : > { %v2431_v8 = vsel %vm1760_vm5, %v4475_v16, -inf  ;;  %v4481_v19 = vsel %vm4469_vm7, -inf, %v2414_v5 }
 0x3d4   : > { %2432 = vmax.xlane.f32.xlu1 %v2431_v8  ;;  %v2428_v54 = vsel %vm1760_vm5, %v4481_v19, -inf }
 0x3d5   : > { %2429 = vmax.xlane.f32.xlu2 %v2428_v54 }
 0x3d7   : > { %v2364_v56 = vpop.f32.mrf.mxu2 }
 0x3d8   : > { %v2340_v2 = vpop.f32.mrf.mxu1 }
 0x3db   : > { %v1875_v23 = vpop.f32.mrf.mxu3 }
 0x3dc   : > { %v1901_v51 = vrot.slane %v1875_v23, 4  ;;  %v1904_v4 = vsel %vm720_vm1, %v1875_v23, %v1903_v12 }
 0x3dd   : > { %v1912_v25 = vperm.slane %v1904_v4, %v3891_v47  ;;  %v1897_v57 = vpop.f32.mrf.mxu0 }
 0x3de   : > { %v1902_v32 = vsel %vm720_vm1, %v1901_v51, %v1831_v62  ;;  %v1913_v34 = vrot.slane %v1897_v57, 4  ;;  %v1916_v42 = vsel %vm720_vm1, %v1897_v57, %v1915_v60 }
 0x3df   : > { %v1908_v0 = vperm.slane %v1902_v32, %v3891_v47  ;;  %v1939_v6 = vrot.slane %v1912_v25, 4  ;;  %v1924_v58 = vperm.slane %v1916_v42, %v3891_v47 }
 0x3e0   : > { %v1914_v35 = vsel %vm720_vm1, %v1913_v34, %v1853_v3 }
 0x3e1   : > { %v1927_v36 = vrot.slane %v1908_v0, 4  ;;  %v1920_v52 = vperm.slane %v1914_v35, %v3891_v47  ;;  %v1937_v18 = vrot.slane %v1924_v58, 4  ;;  %v1940_v26 = vsel %vm720_vm1, %v1924_v58, %v1939_v6 }
 0x3e2   : > { %v1948_v9 = vperm.slane %v1940_v26, %v3913_v14 }
 0x3e3   : > { %v1925_v43 = vrot.slane %v1920_v52, 4  ;;  %v1928_v29 = vsel %vm720_vm1, %v1920_v52, %v1927_v36  ;;  %v1938_v24 = vsel %vm720_vm1, %v1937_v18, %v1912_v25  ;;  %v1877_v30 = vpop.f32.mrf.mxu3 }
 0x3e4   : > { %v1936_v27 = vperm.slane %v1928_v29, %v3913_v14  ;;  %v1944_v44 = vperm.slane %v1938_v24, %v3913_v14  ;;  %v1955_v41 = vrot.slane %v1948_v9, 4 }
 0x3e5   : > { %v1926_v46 = vsel %vm720_vm1, %v1925_v43, %v1908_v0  ;;  %v1899_v48 = vpop.f32.mrf.mxu0 }
 0x3e6   : > { %v1932_v20 = vperm.slane %v1926_v46, %v3913_v14  ;;  %v1951_v37 = vrot.slane %v1936_v27, 4  ;;  %v1953_v59 = vrot.slane %v1944_v44, 4  ;;  %v1956_v39 = vsel %vm720_vm1, 0.0, %v1955_v41 }
 0x3e7   : > { %v1968_v49 = vsel %vm720_vm1, %v1955_v41, %v1944_v44  ;;  %v1973_v55 = vrot.slane %v1956_v39, 4 }
 0x3e8   : > { %v1949_v17 = vrot.slane %v1932_v20, 4  ;;  %v1952_v22 = vsel %vm720_vm1, 0.0, %v1951_v37  ;;  %v1954_v7 = vsel %vm720_vm1, 0.0, %v1953_v59  ;;  %v1972_v11 = vperm.slane %v1968_v49, %v3891_v47 }
 0x3e9   : > { %v1962_v63 = vrot.slane %v1952_v22, 4  ;;  %v1957_v31 = vsel %vm720_vm1, %v1951_v37, %v1932_v20  ;;  %v1974_v38 = vsel %vm720_vm1, %v1973_v55, %v1954_v7 }
 0x3ea   : > { %v1950_v3 = vsel %vm720_vm1, 0.0, %v1949_v17  ;;  %v1961_v62 = vperm.slane %v1957_v31, %v3891_v47  ;;  %v1978_v28 = vperm.slane %v1974_v38, %v3891_v47  ;;  %v1993_v21 = vrot.slane %v1972_v11, 4 }
 0x3eb   : > { %v2386_v50 = vpop.f32.mrf.mxu3  ;;  %v1963_v45 = vsel %vm720_vm1, %v1962_v63, %v1950_v3  ;;  %v3184_v63 = vpop.permute.xlu0 %3183  ;;  %v1250_v3 = vrot.slane %v4457_v33, 4 }
 0x3ec   : > { %v2416_v40 = vmul.f32 0.35355338, %v2386_v50  ;;  %v1967_v1 = vperm.slane %v1963_v45, %v3891_v47  ;;  %v1981_v10 = vrot.slane %v1961_v62, 4  ;;  %v1994_v61 = vsel %vm720_vm1, %v1978_v28, %v1993_v21 }
 0x3ed   : > { %v2410_v5 = vpop.f32.mrf.mxu0  ;;  %v2002_v8 = vperm.slane %v1994_v61, %v3913_v14  ;;  %v1991_v54 = vrot.slane %v1978_v28, 4  ;;  %v3186_v28 = vunpack.i.h.bf16 %v3184_v63  ;;  %v3185_v21 = vunpack.i.l.bf16 %v3184_v63 }
 0x3ee   : > { %v2417_v56 = vmul.f32 0.35355338, %v2410_v5  ;;  %v2426_v2 = vsel %vm4469_vm7, -inf, %v2416_v40  ;;  %v1982_v12 = vsel %vm720_vm1, %v1967_v1, %v1981_v10  ;;  %v1979_v23 = vrot.slane %v1967_v1, 4 }
 0x3ef   : > { %v2434_v60 = vsel %vm1760_vm5, %v2426_v2, -inf  ;;  %v1990_v51 = vperm.slane %v1982_v12, %v3913_v14  ;;  %v2007_v4 = vrot.slane %v2002_v8, 4  ;;  %v1992_v25 = vsel %vm720_vm1, %v1991_v54, %v1972_v11 }
 0x3f0   : > { %2435 = vmax.xlane.f32.xlu2 %v2434_v60  ;;  %v2427_v57 = vsel %vm4469_vm7, -inf, %v2417_v56  ;;  %v1980_v32 = vsel %vm720_vm1, %v1979_v23, %v1961_v62  ;;  %v1998_v34 = vperm.slane %v1992_v25, %v3913_v14  ;;  %v1306_v50 = vrot.slane %v4459_v15, 4 }
 0x3f1   : > { %v2437_v42 = vsel %vm1760_vm5, %v2427_v57, -inf  ;;  %v2008_v0 = vsel %vm720_vm1, %v2007_v4, %v1990_v51  ;;  %v1986_v6 = vperm.slane %v1980_v32, %v3913_v14  ;;  %v2009_v58 = vrot.slane %v1990_v51, 4 }
 0x3f2   : > { %2438 = vmax.xlane.f32.xlu1 %v2437_v42  ;;  %v2003_v35 = vrot.slane %v1998_v34, 4  ;;  %v1318_v61 = vrot.slane %v3186_v28, 4  ;;  %v1262_v5 = vrot.slane %v3185_v21, 4 }
 0x3f3   : > { %v2388_v36 = vpop.f32.mrf.mxu3  ;;  %v2005_v52 = vrot.slane %v1986_v6, 4  ;;  %v2010_v18 = vsel %vm720_vm1, %v2002_v8, %v2009_v58 }
 0x3f4   : > { %v4530_v13 = vsel %vm720_vm1, %v2003_v35, %v1986_v6 }
 0x3f5   : > { %v2412_v26 = vpop.f32.mrf.mxu0  ;;  %v2006_v9 = vsel %vm720_vm1, %v1998_v34, %v2005_v52 }
 0x408   : > { %3188 = vrot.lane.b32.xlu2 %v4463_v53, %s3564_s28  ;;  %s2765_s28 = sshll.u32 %s2762_s27, 4  ;;  %s2766_s28 = int_to_ptr.hbm [resolvable:$true] %s2765_s28 }
 0x409   : > { %s3458_s15 = sshra.s32 %s2766_s28, 4  ;;  %s3459_s15 = int_to_ptr.hbm [resolvable:$true] %s3458_s15 }
 0x40a   : > { %p3465_p11 = scmp.lt.s32.totalorder %s3459_s15, %s4832_s18 }
 0x40b   : > { %3193 = vrot.lane.b32.xlu1 %v4463_v53, %s3565_s16  ;;  %s3460_s16 = scalar_lea.hbm %s3459_s15, 64 }
 0x40c   : > { %p3461_p4 = scmp.ne.s32.totalorder %s3459_s15, %s3460_s16  ;;  %p3466_p10 = scmp.lt.s32.totalorder %s3464_s20, %s3460_s16 }
 0x40e   : > { %p3462_p7 = pnand %p3461_p4, %p3719_p3  ;;  %p3467_p2 = por %p3466_p10, %p3465_p11 }
 0x410   : > { %p3463_p1 = pneg %p3462_p7 }
 0x412   : > { %p3468_p13 = pnand %p3467_p2, %p3463_p1 }
 0x447   : > { %v2433_v43 = vpop.xlane.xlu1 %2432 }
 0x448   : > { %v2441_v29 = vsub.f32 %v4475_v16, %v2433_v43  ;;  %v2430_v24 = vpop.xlane.xlu2 %2429 }
 0x449   : > { %v2440_v30 = vsub.f32 %v4481_v19, %v2430_v24 }
 0x44a   : > { %v2446_v27 = vmul.f32 1.442695, %v2441_v29 }
 0x44b   : > { %v2444_v44 = vmul.f32 1.442695, %v2440_v30 }
 0x44c   : > { %3217 = vpow2.f32 %v2446_v27 }
 0x44d   : > { %3219 = vpow2.f32 %v2444_v44 }
 0x452   : > { %v4539_v41 = vpop.eup %3217 }
 0x453   : > { %v2455_v46 = vsel %vm1760_vm5, %v4539_v41, 0.0  ;;  %v4543_v48 = vpop.eup %3219 }
 0x454   : > { %2456 = vadd.xlane.f32.xlu2 %v2455_v46  ;;  %v2452_v53 = vsel %vm1760_vm5, %v4543_v48, 0.0 }
 0x455   : > { %2453 = vadd.xlane.f32.xlu1 %v2452_v53 }
 0x463   : > { %v2436_v16 = vpop.xlane.xlu2 %2435 }
 0x464   : > { %v2442_v19 = vsub.f32 %v2426_v2, %v2436_v16 }
 0x465   : > { %v2439_v20 = vpop.xlane.xlu1 %2438 }
 0x466   : > { %v2448_v37 = vmul.f32 1.442695, %v2442_v19  ;;  %v2443_v59 = vsub.f32 %v2427_v57, %v2439_v20 }
 0x468   : > { %3221 = vpow2.f32 %v2448_v37  ;;  %v2450_v39 = vmul.f32 1.442695, %v2443_v59 }
 0x46a   : > { %3223 = vpow2.f32 %v2450_v39 }
 0x46b   : > { %v3189_v17 = vpop.permute.xlu2 %3188 }
 0x46c   : > { %2012 = vrot.lane.b32.xlu2 %v2006_v9, %s3570_s30  ;;  %v3190_v22 = vunpack.i.l.bf16 %v3189_v17  ;;  %v3191_v11 = vunpack.i.h.bf16 %v3189_v17 }
 0x46e   : > { %2016 = vrot.lane.b32.xlu1 %v2008_v0, %s3571_s23  ;;  %v4550_v49 = vpop.eup %3221  ;;  %v1248_v31 = vrot.slane %v3190_v22, 4  ;;  %v1304_v62 = vrot.slane %v3191_v11, 4  ;;  %v1251_v45 = vsel %vm720_vm1, %v3190_v22, %v1250_v3  ;;  %v1307_v40 = vsel %vm720_vm1, %v3191_v11, %v1306_v50 }
 0x46f   : > { %v2458_v55 = vsel %vm1760_vm5, %v4550_v49, 0.0  ;;  %v1259_v8 = vperm.slane %v1251_v45, %v3891_v47  ;;  %v1315_v56 = vperm.slane %v1307_v40, %v3891_v47 }
 0x470   : > { %2459 = vadd.xlane.f32.xlu0 %v2458_v55  ;;  %v4554_v7 = vpop.eup %3223  ;;  %v1249_v1 = vsel %vm720_vm1, %v1248_v31, %v4457_v33  ;;  %v1305_v10 = vsel %vm720_vm1, %v1304_v62, %v4459_v15 }
 0x471   : > { %v2461_v38 = vsel %vm1760_vm5, %v4554_v7, 0.0  ;;  %v1255_v2 = vperm.slane %v1249_v1, %v3891_v47  ;;  %v1311_v60 = vperm.slane %v1305_v10, %v3891_v47  ;;  %v1286_v15 = vrot.slane %v1259_v8, 4 }
 0x472   : > { %v1342_v34 = vrot.slane %v1315_v56, 4 }
 0x473   : > { %v1274_v42 = vrot.slane %v1255_v2, 4 }
 0x474   : > { %2020 = vrot.lane.b32.xlu2 %v2010_v18, %s3572_s14  ;;  %v1330_v18 = vrot.slane %v1311_v60, 4 }
 0x478   : > { %2462 = vadd.xlane.f32.xlu0 %v2461_v38 }
 0x47d   : > { %v3194_v54 = vpop.permute.xlu1 %3193 }
 0x47e   : > { %v3196_v12 = vunpack.i.h.bf16 %v3194_v54  ;;  %v3195_v23 = vunpack.i.l.bf16 %v3194_v54 }
 0x480   : > { %v1316_v51 = vrot.slane %v3196_v12, 4  ;;  %v1260_v4 = vrot.slane %v3195_v23, 4  ;;  %v1263_v33 = vsel %vm720_vm1, %v3195_v23, %v1262_v5  ;;  %v1319_v25 = vsel %vm720_vm1, %v3196_v12, %v1318_v61 }
 0x481   : > { %v1271_v57 = vperm.slane %v1263_v33, %v3891_v47  ;;  %v1327_v32 = vperm.slane %v1319_v25, %v3891_v47 }
 0x482   : > { %v1261_v0 = vsel %vm720_vm1, %v1260_v4, %v3185_v21  ;;  %v1317_v6 = vsel %vm720_vm1, %v1316_v51, %v3186_v28 }
 0x483   : > { %v1267_v58 = vperm.slane %v1261_v0, %v3891_v47  ;;  %v1284_v35 = vrot.slane %v1271_v57, 4  ;;  %v1287_v36 = vsel %vm720_vm1, %v1271_v57, %v1286_v15  ;;  %v1323_v52 = vperm.slane %v1317_v6, %v3891_v47 }
 0x484   : > { %v1295_v26 = vperm.slane %v1287_v36, %v3913_v14  ;;  %v1340_v9 = vrot.slane %v1327_v32, 4  ;;  %v1343_v43 = vsel %vm720_vm1, %v1327_v32, %v1342_v34 }
 0x485   : > { %v1272_v29 = vrot.slane %v1267_v58, 4  ;;  %v1275_v24 = vsel %vm720_vm1, %v1267_v58, %v1274_v42  ;;  %v1285_v30 = vsel %vm720_vm1, %v1284_v35, %v1259_v8  ;;  %v1328_v27 = vrot.slane %v1323_v52, 4 }
 0x486   : > { %v1283_v44 = vperm.slane %v1275_v24, %v3913_v14  ;;  %v1291_v46 = vperm.slane %v1285_v30, %v3913_v14  ;;  %v1302_v53 = vrot.slane %v1295_v26, 4  ;;  %v1331_v16 = vsel %vm720_vm1, %v1323_v52, %v1330_v18 }
 0x487   : > { %v1273_v19 = vsel %vm720_vm1, %v1272_v29, %v1255_v2  ;;  %v1329_v20 = vsel %vm720_vm1, %v1328_v27, %v1311_v60  ;;  %v1339_v37 = vperm.slane %v1331_v16, %v3913_v14  ;;  %v1341_v59 = vsel %vm720_vm1, %v1340_v9, %v1315_v56 }
 0x488   : > { %v1279_v39 = vperm.slane %v1273_v19, %v3913_v14  ;;  %v1298_v55 = vrot.slane %v1283_v44, 4  ;;  %v1300_v17 = vrot.slane %v1291_v46, 4  ;;  %v1303_v22 = vsel %vm720_vm1, 0.0, %v1302_v53 }
 0x489   : > { %v1335_v11 = vperm.slane %v1329_v20, %v3913_v14  ;;  %v1347_v63 = vperm.slane %v1341_v59, %v3913_v14  ;;  %v1351_v31 = vperm.slane %v1343_v43, %v3913_v14  ;;  %v1354_v38 = vrot.slane %v1339_v37, 4 }
 0x48a   : > { %v1296_v3 = vrot.slane %v1279_v39, 4  ;;  %v1299_v62 = vsel %vm720_vm1, 0.0, %v1298_v55  ;;  %v1301_v28 = vsel %vm720_vm1, 0.0, %v1300_v17  ;;  %v2202_v21 = vsel %vm720_vm1, %v1298_v55, %v1279_v39 }
 0x48b   : > { %v1352_v50 = vrot.slane %v1335_v11, 4  ;;  %v1355_v45 = vsel %vm720_vm1, 0.0, %v1354_v38  ;;  %v1356_v40 = vrot.slane %v1347_v63, 4  ;;  %v1358_v1 = vrot.slane %v1351_v31, 4 }
 0x48c   : > { %v1297_v10 = vsel %vm720_vm1, 0.0, %v1296_v3  ;;  %v2206_v61 = vperm.slane %v2202_v21, %v3891_v47  ;;  %v2207_v5 = vrot.slane %v1299_v62, 4  ;;  %v2213_v8 = vsel %vm720_vm1, %v1302_v53, %v1291_v46 }
 0x48d   : > { %v1353_v54 = vsel %vm720_vm1, 0.0, %v1352_v50  ;;  %v1357_v56 = vsel %vm720_vm1, 0.0, %v1356_v40  ;;  %v1359_v2 = vsel %vm720_vm1, 0.0, %v1358_v1  ;;  %v2217_v12 = vperm.slane %v2213_v8, %v3891_v47 }
 0x48e   : > { %v2218_v23 = vrot.slane %v1303_v22, 4  ;;  %v2256_v60 = vsel %vm720_vm1, %v1354_v38, %v1335_v11  ;;  %v2261_v51 = vrot.slane %v1355_v45, 4  ;;  %v2267_v4 = vsel %vm720_vm1, %v1358_v1, %v1347_v63 }
 0x48f   : > { %v2238_v33 = vrot.slane %v2217_v12, 4  ;;  %v2260_v25 = vperm.slane %v2256_v60, %v3891_v47  ;;  %v2271_v15 = vperm.slane %v2267_v4, %v3891_v47  ;;  %v2272_v57 = vrot.slane %v1359_v2, 4 }
 0x490   : > { %v2219_v32 = vsel %vm720_vm1, %v2218_v23, %v1301_v28  ;;  %v2208_v34 = vsel %vm720_vm1, %v2207_v5, %v1297_v10  ;;  %v2226_v42 = vrot.slane %v2206_v61, 4  ;;  %v2262_v0 = vsel %vm720_vm1, %v2261_v51, %v1353_v54 }
 0x491   : > { %v2223_v6 = vperm.slane %v2219_v32, %v3891_v47  ;;  %v2273_v58 = vsel %vm720_vm1, %v2272_v57, %v1357_v56  ;;  %v2292_v35 = vrot.slane %v2271_v15, 4  ;;  %v2212_v36 = vperm.slane %v2208_v34, %v3891_v47 }
 0x492   : > { %v2277_v52 = vperm.slane %v2273_v58, %v3891_v47  ;;  %v2266_v18 = vperm.slane %v2262_v0, %v3891_v47  ;;  %v2280_v26 = vrot.slane %v2260_v25, 4 }
 0x493   : > { %v2227_v9 = vsel %vm720_vm1, %v2212_v36, %v2226_v42  ;;  %v2239_v43 = vsel %vm720_vm1, %v2223_v6, %v2238_v33  ;;  %v2224_v29 = vrot.slane %v2212_v36, 4  ;;  %v2236_v24 = vrot.slane %v2223_v6, 4 }
 0x494   : > { %v2235_v30 = vperm.slane %v2227_v9, %v3913_v14  ;;  %v2247_v27 = vperm.slane %v2239_v43, %v3913_v14  ;;  %v2281_v44 = vsel %vm720_vm1, %v2266_v18, %v2280_v26  ;;  %v2293_v46 = vsel %vm720_vm1, %v2277_v52, %v2292_v35 }
 0x495   : > { %v2289_v53 = vperm.slane %v2281_v44, %v3913_v14  ;;  %v2301_v16 = vperm.slane %v2293_v46, %v3913_v14  ;;  %v2225_v19 = vsel %vm720_vm1, %v2224_v29, %v2206_v61  ;;  %v2237_v20 = vsel %vm720_vm1, %v2236_v24, %v2217_v12 }
 0x496   : > { %v2252_v37 = vrot.slane %v2247_v27, 4  ;;  %v2231_v59 = vperm.slane %v2225_v19, %v3913_v14  ;;  %v2243_v39 = vperm.slane %v2237_v20, %v3913_v14  ;;  %v2278_v55 = vrot.slane %v2266_v18, 4 }
 0x497   : > { %v2306_v17 = vrot.slane %v2301_v16, 4  ;;  %v2290_v22 = vrot.slane %v2277_v52, 4  ;;  %v2254_v11 = vrot.slane %v2235_v30, 4  ;;  %v2308_v63 = vrot.slane %v2289_v53, 4 }
 0x498   : > { %v2253_v31 = vsel %vm720_vm1, %v2252_v37, %v2235_v30  ;;  %v2248_v38 = vrot.slane %v2243_v39, 4  ;;  %v2279_v3 = vsel %vm720_vm1, %v2278_v55, %v2260_v25  ;;  %v2250_v62 = vrot.slane %v2231_v59, 4 }
 0x499   : > { %v2307_v28 = vsel %vm720_vm1, %v2306_v17, %v2289_v53  ;;  %v2314_v21 = vpack.c.bf16 %v2253_v31, %v2253_v31  ;;  %v2285_v50 = vperm.slane %v2279_v3, %v3913_v14  ;;  %v2291_v45 = vsel %vm720_vm1, %v2290_v22, %v2271_v15 }
 0x49a   : > { %v2315_v40 = vpack.c.bf16 %v2307_v28, %v2307_v28  ;;  %v2249_v1 = vsel %vm720_vm1, %v2248_v38, %v2231_v59  ;;  %v2297_v10 = vperm.slane %v2291_v45, %v3913_v14  ;;  %v2255_v61 = vsel %vm720_vm1, %v2247_v27, %v2254_v11 }
 0x49b   : > { %v2527_v5 = vunpack.c.l.b16 %v2314_v21  ;;  %v2310_v8 = vpack.c.bf16 %v2249_v1, %v2249_v1  ;;  %v2309_v54 = vsel %vm720_vm1, %v2301_v16, %v2308_v63  ;;  %v2316_v56 = vpack.c.bf16 %v2255_v61, %v2255_v61 }
 0x49c   : > { %v2528_v2 = vunpack.c.l.b16 %v2315_v40  ;;  %v2302_v12 = vrot.slane %v2297_v10, 4  ;;  %v2317_v23 = vpack.c.bf16 %v2309_v54, %v2309_v54  ;;  %v2251_v60 = vsel %vm720_vm1, %v2243_v39, %v2250_v62 }
 0x49d   : > { %v2549_v51 = vunpack.c.l.b16 %v2316_v56  ;;  %v2304_v4 = vrot.slane %v2285_v50, 4  ;;  %v2312_v33 = vpack.c.bf16 %v2251_v60, %v2251_v60  ;;  %v2483_v34 = vunpack.c.l.b16 %v2310_v8 }
 0x49e   : > { %v2529_v25 = vpack.c.b16 %v2528_v2, %v2527_v5  ;;  %v2303_v15 = vsel %vm720_vm1, %v2302_v12, %v2285_v50  ;;  %v2550_v57 = vunpack.c.l.b16 %v2317_v23 }
 0x49f   : > { %v2311_v32 = vpack.c.bf16 %v2303_v15, %v2303_v15  ;;  %v2305_v42 = vsel %vm720_vm1, %v2297_v10, %v2304_v4  ;;  %v2505_v58 = vunpack.c.l.b16 %v2312_v33 }
 0x4a0   : > { %2541 = vmatpush.bf16.msra.mxu3 %v2529_v25  ;;  %v2551_v0 = vpack.c.b16 %v2550_v57, %v2549_v51  ;;  %v2313_v6 = vpack.c.bf16 %v2305_v42, %v2305_v42 }
 0x4a1   : > { %v2484_v35 = vunpack.c.l.b16 %v2311_v32 }
 0x4a2   : > { %2563 = vmatpush.bf16.msrb.mxu0 %v2551_v0  ;;  %v2506_v36 = vunpack.c.l.b16 %v2313_v6 }
 0x4a3   : > { %v2485_v52 = vpack.c.b16 %v2484_v35, %v2483_v34 }
 0x4a4   : > { %v2507_v18 = vpack.c.b16 %v2506_v36, %v2505_v58 }
 0x4a5   : > { %2497 = vmatpush.bf16.msrb.mxu1 %v2485_v52 }
 0x4a6   : > { %2519 = vmatpush.bf16.msrb.mxu2 %v2507_v18 }
 0x4c7   : > { %v2457_v26 = vpop.xlane.xlu2 %2456 }
 0x4c8   : > { %3225 = vrcp.f32 %v2457_v26  ;;  %v2454_v9 = vpop.xlane.xlu1 %2453 }
 0x4c9   : > { %3227 = vrcp.f32 %v2454_v9 }
 0x4ce   : > { %v3226_v43 = vpop.eup %3225 }
 0x4cf   : > { %v2469_v29 = vmul.f32 %v3226_v43, %v4539_v41  ;;  %v3228_v24 = vpop.eup %3227  ;;  %v2013_v46 = vpop.permute.xlu2 %2012 }
 0x4d0   : > { %v2468_v30 = vmul.f32 %v3228_v24, %v4543_v48  ;;  %v2023_v53 = vsel %vm1655_vm2, %v4530_v13, %v2013_v46 }
 0x4d1   : > { %2998 = vst.msk [vmem:[%s4419_s7 + $0x28] sm:$0xff] %vm1760_vm5, %v2469_v29  ;;  %v2478_v27 = vpack.c.bf16 %v2469_v29, %v2469_v29 }
 0x4d2   : > { %2997 = vst.msk [vmem:[%s4419_s7 + $0x20] sm:$0xff] %vm1760_vm5, %v2468_v30  ;;  %v2477_v44 = vpack.c.bf16 %v2468_v30, %v2468_v30 }
 0x4d3   : > { %3002 = vmatmul.msk.bf16.vlgmr.msrb.gmra.mxu2 %vm1760_vm5, %v2478_v27 }
 0x4d4   : > { %3001 = vmatmul.msk.bf16.vlgmr.msrb.gmra.mxu1 %vm1760_vm5, %v2477_v44 }
 0x4d7   : > { %v2021_v16 = vpop.permute.xlu2 %2020 }
 0x4e0   : > { %v2017_v41 = vpop.permute.xlu1 %2016 }
 0x4e1   : > { %v2024_v48 = vsel %vm1760_vm5, %v2023_v53, %v2017_v41 }
 0x4e2   : > { %v2026_v19 = vsel %vm2025_vm8, %v2024_v48, %v2021_v16 }
 0x4e3   : > { %2027 = vst.msk [vmem:[#allocation2] sm:$0xff] %vm617_vm0, %v2026_v19  ;;  %v2460_v20 = vpop.xlane.xlu0 %2459 }
 0x4e4   : > { %3229 = vrcp.f32 %v2460_v20 }
 0x4ea   : > { %v3230_v37 = vpop.eup %3229 }
 0x4eb   : > { %v2470_v59 = vmul.f32 %v3230_v37, %v4550_v49  ;;  %v2463_v39 = vpop.xlane.xlu0 %2462 }
 0x4ec   : > { %3231 = vrcp.f32 %v2463_v39 }
 0x4ed   : > { %2999 = vst.msk [vmem:[%s4419_s7 + $0x30] sm:$0xff] %vm1760_vm5, %v2470_v59  ;;  %v2479_v55 = vpack.c.bf16 %v2470_v59, %v2470_v59 }
 0x4ef   : > { %3003 = vmatmul.msk.bf16.vlgmr.msra.gmra.mxu3 %vm1760_vm5, %v2479_v55 }
 0x4f2   : > { %v3232_v13 = vpop.eup %3231 }
 0x4f3   : > { %v2471_v17 = vmul.f32 %v3232_v13, %v4554_v7 }
 0x4f5   : > { %3000 = vst.msk [vmem:[%s4419_s7 + $0x38] sm:$0xff] %vm1760_vm5, %v2471_v17  ;;  %v2480_v22 = vpack.c.bf16 %v2471_v17, %v2471_v17 }
 0x4f7   : > { %3004 = vmatmul.msk.bf16.vlgmr.msrb.gmra.mxu0 %vm1760_vm5, %v2480_v22 }
 0x551   : > { %v2499_v11 = vpop.f32.mrf.mxu1 }
 0x552   : > { %v2571_v49 = vrot.slane %v2499_v11, 4 }
 0x556   : > { %v2521_v63 = vpop.f32.mrf.mxu2 }
 0x557   : > { %v2583_v62 = vrot.slane %v2521_v63, 4 }
 0x559   : > { %v2501_v31 = vpop.f32.mrf.mxu1 }
 0x55e   : > { %v2523_v38 = vpop.f32.mrf.mxu2 }
 0x572   : > { %v2543_v3 = vpop.f32.mrf.mxu3 }
 0x573   : > { %v2569_v28 = vrot.slane %v2543_v3, 4  ;;  %v2572_v21 = vsel %vm720_vm1, %v2543_v3, %v2571_v49 }
 0x574   : > { %v2580_v50 = vperm.slane %v2572_v21, %v3891_v47  ;;  %v2565_v45 = vpop.f32.mrf.mxu0  ;;  %v2701_v21 = vld [vmem:[#allocation14 + $0x18] sm:$0xff] }
 0x575   : > { %v2570_v7 = vsel %vm720_vm1, %v2569_v28, %v2499_v11  ;;  %v2581_v40 = vrot.slane %v2565_v45, 4  ;;  %v2584_v1 = vsel %vm720_vm1, %v2565_v45, %v2583_v62  ;;  %v2700_v28 = vld [vmem:[#allocation14 + $0x10] sm:$0xff]  ;;  %v2699_v45 = vld [vmem:[#allocation14 + $0x8] sm:$0xff] }
 0x576   : > { %v2576_v10 = vperm.slane %v2570_v7, %v3891_v47  ;;  %v2607_v61 = vrot.slane %v2580_v50, 4  ;;  %v2592_v5 = vperm.slane %v2584_v1, %v3891_v47 }
 0x577   : > { %v2582_v8 = vsel %vm720_vm1, %v2581_v40, %v2521_v63 }
 0x578   : > { %v2595_v54 = vrot.slane %v2576_v10, 4  ;;  %v2588_v56 = vperm.slane %v2582_v8, %v3891_v47  ;;  %v2605_v2 = vrot.slane %v2592_v5, 4  ;;  %v2608_v12 = vsel %vm720_vm1, %v2592_v5, %v2607_v61 }
 0x579   : > { %v2616_v23 = vperm.slane %v2608_v12, %v3913_v14 }
 0x57a   : > { %v2593_v60 = vrot.slane %v2588_v56, 4  ;;  %v2596_v51 = vsel %vm720_vm1, %v2588_v56, %v2595_v54  ;;  %v2606_v4 = vsel %vm720_vm1, %v2605_v2, %v2580_v50  ;;  %v2545_v33 = vpop.f32.mrf.mxu3  ;;  %v2698_v50 = vld [vmem:[#allocation14] sm:$0xff]  ;;  %v2695_v54 = vld [vmem:[#allocation2] sm:$0xff] }
 0x57b   : > { %v2604_v25 = vperm.slane %v2596_v51, %v3913_v14  ;;  %v2612_v15 = vperm.slane %v2606_v4, %v3913_v14  ;;  %v2623_v57 = vrot.slane %v2616_v23, 4  ;;  %v2702_v7 = vpack.c.bf16 %v2699_v45, %v2698_v50 }
 0x57c   : > { %v2594_v32 = vsel %vm720_vm1, %v2593_v60, %v2576_v10  ;;  %v2567_v34 = vpop.f32.mrf.mxu0 }
 0x57d   : > { %v2600_v42 = vperm.slane %v2594_v32, %v3913_v14  ;;  %v2619_v0 = vrot.slane %v2604_v25, 4  ;;  %v2621_v6 = vrot.slane %v2612_v15, 4  ;;  %v2624_v58 = vsel %vm720_vm1, 0.0, %v2623_v57 }
 0x57e   : > { %v2636_v35 = vsel %vm720_vm1, %v2623_v57, %v2612_v15  ;;  %v2641_v36 = vrot.slane %v2624_v58, 4 }
 0x57f   : > { %v2617_v52 = vrot.slane %v2600_v42, 4  ;;  %v2620_v18 = vsel %vm720_vm1, 0.0, %v2619_v0  ;;  %v2622_v26 = vsel %vm720_vm1, 0.0, %v2621_v6  ;;  %v2625_v9 = vsel %vm720_vm1, %v2619_v0, %v2600_v42 }
 0x580   : > { %v2630_v43 = vrot.slane %v2620_v18, 4  ;;  %v2629_v29 = vperm.slane %v2625_v9, %v3891_v47  ;;  %v2640_v24 = vperm.slane %v2636_v35, %v3891_v47  ;;  %v2642_v30 = vsel %vm720_vm1, %v2641_v36, %v2622_v26 }
 0x581   : > { %v2618_v27 = vsel %vm720_vm1, 0.0, %v2617_v52  ;;  %v2646_v44 = vperm.slane %v2642_v30, %v3891_v47 }
 0x582   : > { %v2631_v46 = vsel %vm720_vm1, %v2630_v43, %v2618_v27  ;;  %v2649_v53 = vrot.slane %v2629_v29, 4  ;;  %v2661_v41 = vrot.slane %v2640_v24, 4 }
 0x583   : > { %v2635_v16 = vperm.slane %v2631_v46, %v3891_v47  ;;  %v2659_v48 = vrot.slane %v2646_v44, 4 }
 0x584   : > { %v2662_v20 = vsel %vm720_vm1, %v2646_v44, %v2661_v41 }
 0x585   : > { %v2650_v19 = vsel %vm720_vm1, %v2635_v16, %v2649_v53  ;;  %v2647_v37 = vrot.slane %v2635_v16, 4  ;;  %v2660_v59 = vsel %vm720_vm1, %v2659_v48, %v2640_v24  ;;  %v2670_v17 = vperm.slane %v2662_v20, %v3913_v14 }
 0x586   : > { %v2658_v39 = vperm.slane %v2650_v19, %v3913_v14  ;;  %v2666_v55 = vperm.slane %v2660_v59, %v3913_v14 }
 0x587   : > { %v2648_v13 = vsel %vm720_vm1, %v2647_v37, %v2629_v29  ;;  %v2675_v3 = vrot.slane %v2670_v17, 4 }
 0x588   : > { %v2677_v22 = vrot.slane %v2658_v39, 4  ;;  %v2654_v11 = vperm.slane %v2648_v13, %v3913_v14  ;;  %v2671_v47 = vrot.slane %v2666_v55, 4  ;;  %v2703_v14 = vpack.c.bf16 %v2701_v21, %v2700_v28 }
 0x589   : > { %v2676_v62 = vsel %vm720_vm1, %v2675_v3, %v2658_v39 }
 0x58a   : > { %v2678_v63 = vsel %vm720_vm1, %v2670_v17, %v2677_v22  ;;  %v2673_v31 = vrot.slane %v2654_v11, 4  ;;  %v2672_v38 = vsel %vm720_vm1, %v2671_v47, %v2654_v11  ;;  %2717 = vmatpush.bf16.msra.mxu1 %v2703_v14 }
 0x58b   : > { %2688 = vrot.lane.b32.xlu1 %v2678_v63, %s3572_s14 }
 0x58c   : > { %v2674_v49 = vsel %vm720_vm1, %v2666_v55, %v2673_v31 }
 0x58d   : > { %2680 = vrot.lane.b32.xlu0 %v2674_v49, %s3570_s30 }
 0x58e   : > { %2718 = vmatpush.bf16.msra.mxu1 %v2702_v7 }
 0x595   : > { %2684 = vrot.lane.b32.xlu0 %v2676_v62, %s3571_s23 }
 0x5fd   : > { %v2689_v61 = vpop.permute.xlu1 %2688 }
 0x5ff   : > { %v2681_v40 = vpop.permute.xlu0 %2680 }
 0x600   : > { %v2691_v1 = vsel %vm1655_vm2, %v2672_v38, %v2681_v40 }
 0x607   : > { %v2685_v10 = vpop.permute.xlu0 %2684 }
 0x608   : > { %v2692_v5 = vsel %vm1760_vm5, %v2691_v1, %v2685_v10 }
 0x609   : > { %v2693_v8 = vsel %vm2025_vm8, %v2692_v5, %v2689_v61 }
 0x60a   : > { %2694 = vst.msk [vmem:[#allocation2 + $0x8] sm:$0xff] %vm617_vm0, %v2693_v8 }
 0x611   : > { %v2696_v56 = vld [vmem:[#allocation2 + $0x8] sm:$0xff] }
 0x612   : > { %v2697_v2 = vpack.c.bf16 %v2696_v56, %v2695_v54 }
 0x614   : > { %3005 = vmatmul.msk.bf16.vlgmr.msra.gmra.mxu1 %vm617_vm0, %v2697_v2 }
 0x615   : > { %3471 = shalt.err (!%p3468_p13)
}
 0x616   : > { %s3573_s7 = smov 128   ;;  %s4833_s14 = sld [smem:[#allocation34_spill]] }
 0x617   : > { %3044 = dma.vmem_to_hbm [thread:$0]  (%p3719_p3), %s2764_s17, 1024, %s2766_s28, %s2733_s12, %s3573_s7, %s3573_s7, %s3570_s30  }
 0x618   : > { %s3018_s26 = sshll.u32 %s3660_s25, 4  ;;  %s584_s11 = scalar_lea.vmem [#allocation15], %s2970_s10 }
 0x619   : > { %s4834_s15 = sld [smem:[#allocation35_spill]]  ;;  %s2745_s5 = sshll.u32 %s584_s11, 4  ;;  %s2746_s5 = int_to_ptr.vmem [resolvable:$true] %s2745_s5 }
 0x61a   : > { %s2728_s17 = scalar_lea.sflag [#allocation5], %s3815_s19 }
 0x61c   : > { %v3200_v12 = vld [vmem:[%s4833_s14] ss:$0 sm:$0xff] }
 0x61f   : > { %s2744_s16 = scalar_lea.hbm %s4834_s15, %s3018_s26  ;;  %s3492_s20 = scalar_lea.hbm %s4834_s15, 32 }
 0x620   : > { %s2747_s9 = sshll.u32 %s2744_s16, 4  ;;  %s2748_s9 = int_to_ptr.hbm [resolvable:$true] %s2747_s9 }
 0x621   : > { %s3486_s25 = sshra.s32 %s2748_s9, 4  ;;  %s3487_s25 = int_to_ptr.hbm [resolvable:$true] %s3486_s25 }
 0x622   : > { %s3488_s28 = scalar_lea.hbm %s3487_s25, 16  ;;  %p3493_p12 = scmp.lt.s32.totalorder %s3487_s25, %s4834_s15 }
 0x623   : > { %p3489_p0 = scmp.ne.s32.totalorder %s3487_s25, %s3488_s28  ;;  %p3494_p5 = scmp.lt.s32.totalorder %s3492_s20, %s3488_s28 }
 0x625   : > { %p3490_p8 = pnand %p3489_p0, %p3719_p3  ;;  %p3495_p4 = por %p3494_p5, %p3493_p12 }
 0x627   : > { %p3491_p9 = pneg %p3490_p8 }
 0x629   : > { %p3496_p7 = pnand %p3495_p4, %p3491_p9 }
 0x691   : > { %v2720_v23 = vpop.f32.mrf.mxu1 }
 0x692   : > { %v2721_v60 = vadd.f32 %v3200_v12, %v2720_v23 }
 0x694   : > { %2725 = vst.msk [vmem:[%s584_s11] sm:$0xff] %vm617_vm0, %v2721_v60 }
 0x699   : > { %v2722_v51 = vpop.f32.mrf.mxu1 }
 0x69a   : > { %v2723_v4 = vadd.f32 %v3200_v12, %v2722_v51 }
 0x69c   : > { %2726 = vst.msk [vmem:[%s584_s11 + $0x8] sm:$0xff] %vm617_vm0, %v2723_v4 }
 0x69d   : > { %3499 = shalt.err (!%p3496_p7)
}
 0x69e   : > { %3043 = dma.vmem_to_hbm [thread:$0]  (%p3719_p3), %s2746_s5, 256, %s2748_s9, %s2728_s17, %s3573_s7, %s3573_s7, %s3570_s30  }
 0x69f PF: > { %s4835_s19 = sld [smem:[#allocation24_spill]]  ;;  %p4837_p1 = scmp.ge.s32.totalorder %s3554_s24, 2 }
 0x6a1   : > { %p3071_p11 = pnand %p4837_p1, %p3674_p6 }
 0x6a3   : > { %p3072_p10 = pneg %p3071_p11 }
 0x6a5   : > { %s2780_s23 = sand.u32 1, %s4835_s19  }
 0x6a6   : > { %s2781_s14 = scalar_lea.sflag [#allocation5], %s2780_s23 }
 0x6a7   : > { %3533 = dma.done.wait (%p3072_p10), %s2781_s14, 256  }
 0x6a8   : > { %3535 = vsyncadd (%p3072_p10), %s2781_s14, 4294967040  ;;  %s2791_s26 = scalar_lea.sflag [#allocation17], %s2780_s23 }
 0x6a9   : > { %3537 = dma.done.wait (%p3072_p10), %s2791_s26, 1024  }
 0x6aa   : > { %3539 = vsyncadd (%p3072_p10), %s2791_s26, 4294966272  ;;  %s4838_s24 = sld [smem:[#allocation27_spill]]  ;;  %s4841_s21 = smov %s3546_s22 }
 0x6ab   : > { %s4839_s13 = sld [smem:[#allocation25_spill]] }
 0x6ac   : > { %s4840_s23 = sld [smem:[#allocation28_spill]] }
 0x6b0   : > { %p34_p3 = scmp.ge.s32.totalorder %s4838_s24, 4  }
 0x6b1   : > { %s4842_s22 = smov %s4839_s13 }
 0x6b2   :  { %36 = sbr.rel (!%p34_p3) target bundleno = 20 (0x14), region = 168 }
 0x6b7   :  { %2797 = vsyncpa [#allocation4], 1 }
 0x6b8   :  { %2799 = vsyncpa [#allocation4 + $0x1], 1 }
 0x6b9   :  { %2800 = vsyncpa [#allocation7], 1 }
 0x6ba   :  { %2802 = vsyncpa [#allocation7 + $0x1], 1 }
 0x6bb   :  { %2803 = vsyncpa [#allocation10], 1 }
 0x6bc   :  { %2804 = vsyncpa [#allocation13], 1 }
 0x6bd   :  { %2805 = vsyncpa [#allocation5], 1 }
 0x6be   :  { %2807 = vsyncpa [#allocation5 + $0x1], 1 }
 0x6bf   :  { %2808 = vsyncpa [#allocation17], 1 }
 0x6c0   :  { %2810 = vsyncpa [#allocation17 + $0x1], 1 }

</bundles_post_ra>
